<compile_context>
chip_gen: v6e
topology: v6e:2x2x1
jax: 0.10.0
libtpu: 0.0.40
codegen_flags: <defaults>
</compile_context>

<pallas_src>
from functools import partial

import jax
import jax.numpy as jnp
from jax.experimental import pallas as pl
from jax.experimental.pallas import tpu as pltpu


def mha_kernel(x_ref, wq_ref, wk_ref, wv_ref, bq_ref, bk_ref, bv_ref,
               wout_ref, bout_ref,
               out_ref, attn_ref,
               k_cache, v_cache, ctx_scratch,
               *, n_heads, d_k, tq):
    qi = pl.program_id(1)
    n_q = pl.num_programs(1)
    N = x_ref.shape[1]
    scale = 1.0 / (d_k ** 0.5)

    # ---- K / V projections for the full sequence: once per batch row -------
    @pl.when(qi == 0)
    def _():
        x_full = x_ref[0].astype(jnp.bfloat16)                       # (N, D)
        for h in range(n_heads):
            k_h = jnp.dot(x_full, wk_ref[h],
                          preferred_element_type=jnp.float32) + bk_ref[h]
            v_h = jnp.dot(x_full, wv_ref[h],
                          preferred_element_type=jnp.float32) + bv_ref[h]
            k_cache[h] = k_h.astype(jnp.bfloat16)                    # (N, d_k)
            v_cache[h] = v_h.astype(jnp.bfloat16)
        attn_ref[0] = jnp.zeros((1, N), jnp.float32)                 # init accumulator

    # ---- query tile ---------------------------------------------------------
    row0 = pl.multiple_of(qi * tq, tq)
    x_q = x_ref[0, pl.ds(row0, tq), :].astype(jnp.bfloat16)          # (TQ, D)

    attn_colsum = jnp.zeros((1, N), jnp.float32)

    # TODO(synk): for very long sequences (N >~ 2k, esp. v7x 64 MiB VMEM)
    # stream K/V tiles with an online softmax (flash-style), and switch this
    # static head loop to lax.fori_loop for large n_heads.
    for h in range(n_heads):
        # q projection (K = D contraction), bias, 1/sqrt(d_k) folded into q.
        q_h = (jnp.dot(x_q, wq_ref[h],
                       preferred_element_type=jnp.float32) + bq_ref[h]) * scale
        # scores = q @ k^T without materializing a transpose (MXU consumes
        # K in its stored layout).
        s = jax.lax.dot_general(
            q_h.astype(jnp.bfloat16), k_cache[h],
            dimension_numbers=(((1,), (1,)), ((), ())),
            preferred_element_type=jnp.float32)                      # (TQ, N)
        s = s - jnp.max(s, axis=-1, keepdims=True)
        e = jnp.exp(s)
        p = e * pl.reciprocal(jnp.sum(e, axis=-1, keepdims=True), approx=True)
        attn_colsum = attn_colsum + jnp.sum(p, axis=0, keepdims=True)
        # context for head h written into its column slab of the (TQ, D) tile.
        ctx_scratch[:, h * d_k:(h + 1) * d_k] = jnp.dot(
            p.astype(jnp.bfloat16), v_cache[h],
            preferred_element_type=jnp.float32)                      # (TQ, d_k)

    # ---- single K=D out-projection for the whole query tile ----------------
    out = jnp.dot(ctx_scratch[...].astype(jnp.bfloat16), wout_ref[...],
                  preferred_element_type=jnp.float32) + bout_ref[...]
    out_ref[0] = out.astype(out_ref.dtype)

    # ---- attn.mean(heads).mean(queries): accumulate column sums over tiles --
    attn_ref[0] = attn_ref[0] + attn_colsum

    @pl.when(qi == n_q - 1)
    def _():
        attn_ref[0] = attn_ref[0] * (1.0 / (n_heads * N))


def _pick_query_tile(n):
    """Largest of {256, 128} dividing N (256 preferred for v6e/v7x MXU), else N."""
    for t in (256, 128):
        if n % t == 0:
            return t
    return n


@partial(jax.jit, static_argnums=(5,))
def multihead_attention(x, wqkv, bqkv, wout, bout, n_heads):
    """x: (B, N, D) f32.  Returns (out (B,N,D) f32, attn_mean (B,N) f32)."""
    B, N, D = x.shape
    d_k = D // n_heads
    tq = _pick_query_tile(N)
    n_q = N // tq

    # --- trace-time weight relayout (free): per-head q/k/v weight stacks ----
    # original qkv columns are interleaved per head: [q_h | k_h | v_h] blocks.
    w4 = wqkv.reshape(D, n_heads, 3, d_k)
    wq3 = jnp.transpose(w4[:, :, 0, :], (1, 0, 2)).astype(jnp.bfloat16)  # (H,D,dk)
    wk3 = jnp.transpose(w4[:, :, 1, :], (1, 0, 2)).astype(jnp.bfloat16)
    wv3 = jnp.transpose(w4[:, :, 2, :], (1, 0, 2)).astype(jnp.bfloat16)
    b3 = bqkv.reshape(n_heads, 3, d_k)
    bq3 = b3[:, 0, :].reshape(n_heads, 1, d_k)
    bk3 = b3[:, 1, :].reshape(n_heads, 1, d_k)
    bv3 = b3[:, 2, :].reshape(n_heads, 1, d_k)
    wout_bf16 = wout.astype(jnp.bfloat16)
    bout2 = bout.reshape(1, D)

    kernel = partial(mha_kernel, n_heads=n_heads, d_k=d_k, tq=tq)
    full3 = lambda b, q: (0, 0, 0)

    out, attn_mean = pl.pallas_call(
        kernel,
        out_shape=(jax.ShapeDtypeStruct((B, N, D), jnp.float32),
                   jax.ShapeDtypeStruct((B, 1, N), jnp.float32)),
        grid_spec=pltpu.PrefetchScalarGridSpec(
            num_scalar_prefetch=0,
            grid=(B, n_q),
            in_specs=[
                pl.BlockSpec((1, N, D), lambda b, q: (b, 0, 0)),   # x (full seq)
                pl.BlockSpec((n_heads, D, d_k), full3),            # Wq per head
                pl.BlockSpec((n_heads, D, d_k), full3),            # Wk per head
                pl.BlockSpec((n_heads, D, d_k), full3),            # Wv per head
                pl.BlockSpec((n_heads, 1, d_k), full3),            # bq per head
                pl.BlockSpec((n_heads, 1, d_k), full3),            # bk per head
                pl.BlockSpec((n_heads, 1, d_k), full3),            # bv per head
                pl.BlockSpec((D, D), lambda b, q: (0, 0)),         # Wout (full)
                pl.BlockSpec((1, D), lambda b, q: (0, 0)),         # bout
            ],
            out_specs=[
                pl.BlockSpec((1, tq, D), lambda b, q: (b, q, 0)),  # output tile
                pl.BlockSpec((1, 1, N), lambda b, q: (b, 0, 0)),   # attn mean (acc)
            ],
            scratch_shapes=[
                pltpu.VMEM((n_heads, N, d_k), jnp.bfloat16),       # K cache
                pltpu.VMEM((n_heads, N, d_k), jnp.bfloat16),       # V cache
                pltpu.VMEM((tq, D), jnp.float32),                  # context tile
            ],
        ),
        compiler_params=pltpu.CompilerParams(
            dimension_semantics=("parallel", "arbitrary"),
            vmem_limit_bytes=32 * 1024 * 1024,
        ),
    )(x, wq3, wk3, wv3, bq3, bk3, bv3, wout_bf16, bout2)

    return out, attn_mean.reshape(B, N)


def reference_forward(x, wqkv, bqkv, wout, bout, n_heads):
    """Pure-JAX f32 mirror of the PyTorch forward (for verification)."""
    B, N, D = x.shape
    d_k = D // n_heads
    qkv = x @ wqkv + bqkv                                            # (B, N, 3D)
    qkv = qkv.reshape(B, N, n_heads, 3 * d_k).transpose(2, 0, 1, 3)  # (H,B,N,3dk)
    q, k, v = jnp.split(qkv, 3, axis=-1)
    scores = jnp.einsum('hbnd,hbmd->hbnm', q, k) / (d_k ** 0.5)
    attn = jax.nn.softmax(scores, axis=-1)
    ctx = jnp.einsum('hbnm,hbmd->hbnd', attn, v).transpose(1, 2, 0, 3).reshape(B, N, D)
    attn_mean = attn.mean(axis=0).mean(axis=1)                       # (B, N)
    return ctx @ wout + bout, attn_mean


if __name__ == "__main__":
    B, N, D, H = 2, 8, 32, 4        # batch, seq, d_model, n_heads

    key = jax.random.PRNGKey(0)
    kx, k1, k2, k3, k4 = jax.random.split(key, 5)

    x = jax.random.normal(kx, (B, N, D), dtype=jnp.float32)

    # Deterministic nn.Linear-style init: U(-1/sqrt(fan_in), 1/sqrt(fan_in)).
    bound = 1.0 / (D ** 0.5)
    wqkv = jax.random.uniform(k1, (D, 3 * D), jnp.float32, -bound, bound)
    bqkv = jax.random.uniform(k2, (3 * D,), jnp.float32, -bound, bound)
    wout = jax.random.uniform(k3, (D, D), jnp.float32, -bound, bound)
    bout = jax.random.uniform(k4, (D,), jnp.float32, -bound, bound)

    out, attn_mean = multihead_attention(x, wqkv, bqkv, wout, bout, H)
    out = jax.block_until_ready(out)
    attn_mean = jax.block_until_ready(attn_mean)

    out_ref, attn_mean_ref = reference_forward(x, wqkv, bqkv, wout, bout, H)

    assert out.shape == (B, N, D) and attn_mean.shape == (B, N)
    # bf16 MXU inputs + approx reciprocal -> loosened tolerance vs. f32 reference.
    assert jnp.allclose(out, out_ref, atol=5e-2, rtol=5e-2), \
        f"max |diff| = {jnp.max(jnp.abs(out - out_ref))}"
    assert jnp.allclose(attn_mean, attn_mean_ref, atol=1e-2, rtol=1e-2), \
        f"max |diff| = {jnp.max(jnp.abs(attn_mean - attn_mean_ref))}"

    print("KERNEL_OK")
</pallas_src>

<mosaic_0001>
module attributes {stable_mosaic.version = 11 : i64} {
  func.func @mha_kernel(%arg0: i32, %arg1: i32, %arg2: memref<1x8x32xf32, #tpu.memory_space<vmem>>, %arg3: memref<4x32x8xbf16, #tpu.memory_space<vmem>>, %arg4: memref<4x32x8xbf16, #tpu.memory_space<vmem>>, %arg5: memref<4x32x8xbf16, #tpu.memory_space<vmem>>, %arg6: memref<4x1x8xf32, #tpu.memory_space<vmem>>, %arg7: memref<4x1x8xf32, #tpu.memory_space<vmem>>, %arg8: memref<4x1x8xf32, #tpu.memory_space<vmem>>, %arg9: memref<32x32xbf16, #tpu.memory_space<vmem>>, %arg10: memref<1x32xf32, #tpu.memory_space<vmem>>, %arg11: memref<1x8x32xf32, #tpu.memory_space<vmem>>, %arg12: memref<1x1x8xf32, #tpu.memory_space<vmem>>, %arg13: memref<4x8x8xbf16, #tpu.memory_space<vmem>>, %arg14: memref<4x8x8xbf16, #tpu.memory_space<vmem>>, %arg15: memref<8x32xf32, #tpu.memory_space<vmem>>) attributes {dimension_semantics = [#tpu.dimension_semantics<parallel>, #tpu.dimension_semantics<arbitrary>], iteration_bounds = array<i64: 2, 1>, scalar_prefetch = 0 : i64, scratch_operands = 3 : i64, tpu.core_type = #tpu.core_type<tc>, window_params = [{transform_indices = @transform_0, window_bounds = array<i64: 1, 8, 32>}, {pipeline_mode = #tpu.pipeline_mode<synchronous>, transform_indices = @transform_1, window_bounds = array<i64: 4, 32, 8>}, {pipeline_mode = #tpu.pipeline_mode<synchronous>, transform_indices = @transform_2, window_bounds = array<i64: 4, 32, 8>}, {pipeline_mode = #tpu.pipeline_mode<synchronous>, transform_indices = @transform_3, window_bounds = array<i64: 4, 32, 8>}, {pipeline_mode = #tpu.pipeline_mode<synchronous>, transform_indices = @transform_4, window_bounds = array<i64: 4, 1, 8>}, {pipeline_mode = #tpu.pipeline_mode<synchronous>, transform_indices = @transform_5, window_bounds = array<i64: 4, 1, 8>}, {pipeline_mode = #tpu.pipeline_mode<synchronous>, transform_indices = @transform_6, window_bounds = array<i64: 4, 1, 8>}, {pipeline_mode = #tpu.pipeline_mode<synchronous>, transform_indices = @transform_7, window_bounds = array<i64: 32, 32>}, {pipeline_mode = #tpu.pipeline_mode<synchronous>, transform_indices = @transform_8, window_bounds = array<i64: 1, 32>}, {transform_indices = @transform_9, window_bounds = array<i64: 1, 8, 32>}, {transform_indices = @transform_10, window_bounds = array<i64: 1, 1, 8>}]} {
    %c0_i32 = arith.constant 0 : i32
    %0 = arith.cmpi eq, %arg1, %c0_i32 : i32
    %1 = arith.extui %0 : i1 to i32
    %c0_i32_0 = arith.constant 0 : i32
    %2 = arith.cmpi ne, %1, %c0_i32_0 : i32
    scf.if %2 {
      %c0_98 = arith.constant 0 : index
      %c0_99 = arith.constant 0 : index
      %c0_100 = arith.constant 0 : index
      %153 = vector.load %arg2[%c0_98, %c0_99, %c0_100] : memref<1x8x32xf32, #tpu.memory_space<vmem>>, vector<1x8x32xf32>
      %154 = vector.shape_cast %153 : vector<1x8x32xf32> to vector<8x32xf32>
      %155 = arith.truncf %154 : vector<8x32xf32> to vector<8x32xbf16>
      %c0_101 = arith.constant 0 : index
      %c0_102 = arith.constant 0 : index
      %c0_103 = arith.constant 0 : index
      %156 = vector.load %arg4[%c0_101, %c0_102, %c0_103] : memref<4x32x8xbf16, #tpu.memory_space<vmem>>, vector<1x32x8xbf16>
      %157 = vector.shape_cast %156 : vector<1x32x8xbf16> to vector<32x8xbf16>
      %cst_104 = arith.constant dense<0.000000e+00> : vector<8x8xf32>
      %158 = tpu.matmul %155, %157, %cst_104 {dimension_numbers = #tpu.dot_dimension_numbers<[1], [0], [0], [1], [0, 0, 1, 1], [], []>} : vector<8x32xbf16>, vector<32x8xbf16>, vector<8x8xf32> -> vector<8x8xf32>
      %c0_105 = arith.constant 0 : index
      %c0_106 = arith.constant 0 : index
      %c0_107 = arith.constant 0 : index
      %159 = vector.load %arg7[%c0_105, %c0_106, %c0_107] : memref<4x1x8xf32, #tpu.memory_space<vmem>>, vector<1x1x8xf32>
      %160 = vector.shape_cast %159 : vector<1x1x8xf32> to vector<1x8xf32>
      %161 = vector.broadcast %160 : vector<1x8xf32> to vector<8x8xf32>
      %162 = arith.addf %158, %161 : vector<8x8xf32>
      %c0_108 = arith.constant 0 : index
      %c0_109 = arith.constant 0 : index
      %c0_110 = arith.constant 0 : index
      %163 = vector.load %arg5[%c0_108, %c0_109, %c0_110] : memref<4x32x8xbf16, #tpu.memory_space<vmem>>, vector<1x32x8xbf16>
      %164 = vector.shape_cast %163 : vector<1x32x8xbf16> to vector<32x8xbf16>
      %cst_111 = arith.constant dense<0.000000e+00> : vector<8x8xf32>
      %165 = tpu.matmul %155, %164, %cst_111 {dimension_numbers = #tpu.dot_dimension_numbers<[1], [0], [0], [1], [0, 0, 1, 1], [], []>} : vector<8x32xbf16>, vector<32x8xbf16>, vector<8x8xf32> -> vector<8x8xf32>
      %c0_112 = arith.constant 0 : index
      %c0_113 = arith.constant 0 : index
      %c0_114 = arith.constant 0 : index
      %166 = vector.load %arg8[%c0_112, %c0_113, %c0_114] : memref<4x1x8xf32, #tpu.memory_space<vmem>>, vector<1x1x8xf32>
      %167 = vector.shape_cast %166 : vector<1x1x8xf32> to vector<1x8xf32>
      %168 = vector.broadcast %167 : vector<1x8xf32> to vector<8x8xf32>
      %169 = arith.addf %165, %168 : vector<8x8xf32>
      %170 = arith.truncf %162 : vector<8x8xf32> to vector<8x8xbf16>
      %c0_115 = arith.constant 0 : index
      %c0_116 = arith.constant 0 : index
      %c0_117 = arith.constant 0 : index
      %171 = vector.load %arg13[%c0_115, %c0_116, %c0_117] : memref<4x8x8xbf16, #tpu.memory_space<vmem>>, vector<1x8x8xbf16>
      %172 = vector.shape_cast %171 : vector<1x8x8xbf16> to vector<8x8xbf16>
      %173 = vector.shape_cast %170 : vector<8x8xbf16> to vector<1x8x8xbf16>
      tpu.vector_store %arg13[%c0_115, %c0_116, %c0_117], %173 {strides = array<i32>} : memref<4x8x8xbf16, #tpu.memory_space<vmem>>, vector<1x8x8xbf16>,
      %174 = arith.truncf %169 : vector<8x8xf32> to vector<8x8xbf16>
      %c0_118 = arith.constant 0 : index
      %c0_119 = arith.constant 0 : index
      %c0_120 = arith.constant 0 : index
      %175 = vector.load %arg14[%c0_118, %c0_119, %c0_120] : memref<4x8x8xbf16, #tpu.memory_space<vmem>>, vector<1x8x8xbf16>
      %176 = vector.shape_cast %175 : vector<1x8x8xbf16> to vector<8x8xbf16>
      %177 = vector.shape_cast %174 : vector<8x8xbf16> to vector<1x8x8xbf16>
      tpu.vector_store %arg14[%c0_118, %c0_119, %c0_120], %177 {strides = array<i32>} : memref<4x8x8xbf16, #tpu.memory_space<vmem>>, vector<1x8x8xbf16>,
      %c1_121 = arith.constant 1 : index
      %c0_122 = arith.constant 0 : index
      %c0_123 = arith.constant 0 : index
      %178 = vector.load %arg4[%c1_121, %c0_122, %c0_123] : memref<4x32x8xbf16, #tpu.memory_space<vmem>>, vector<1x32x8xbf16>
      %179 = vector.shape_cast %178 : vector<1x32x8xbf16> to vector<32x8xbf16>
      %cst_124 = arith.constant dense<0.000000e+00> : vector<8x8xf32>
      %180 = tpu.matmul %155, %179, %cst_124 {dimension_numbers = #tpu.dot_dimension_numbers<[1], [0], [0], [1], [0, 0, 1, 1], [], []>} : vector<8x32xbf16>, vector<32x8xbf16>, vector<8x8xf32> -> vector<8x8xf32>
      %c1_125 = arith.constant 1 : index
      %c0_126 = arith.constant 0 : index
      %c0_127 = arith.constant 0 : index
      %181 = vector.load %arg7[%c1_125, %c0_126, %c0_127] : memref<4x1x8xf32, #tpu.memory_space<vmem>>, vector<1x1x8xf32>
      %182 = vector.shape_cast %181 : vector<1x1x8xf32> to vector<1x8xf32>
      %183 = vector.broadcast %182 : vector<1x8xf32> to vector<8x8xf32>
      %184 = arith.addf %180, %183 : vector<8x8xf32>
      %c1_128 = arith.constant 1 : index
      %c0_129 = arith.constant 0 : index
      %c0_130 = arith.constant 0 : index
      %185 = vector.load %arg5[%c1_128, %c0_129, %c0_130] : memref<4x32x8xbf16, #tpu.memory_space<vmem>>, vector<1x32x8xbf16>
      %186 = vector.shape_cast %185 : vector<1x32x8xbf16> to vector<32x8xbf16>
      %cst_131 = arith.constant dense<0.000000e+00> : vector<8x8xf32>
      %187 = tpu.matmul %155, %186, %cst_131 {dimension_numbers = #tpu.dot_dimension_numbers<[1], [0], [0], [1], [0, 0, 1, 1], [], []>} : vector<8x32xbf16>, vector<32x8xbf16>, vector<8x8xf32> -> vector<8x8xf32>
      %c1_132 = arith.constant 1 : index
      %c0_133 = arith.constant 0 : index
      %c0_134 = arith.constant 0 : index
      %188 = vector.load %arg8[%c1_132, %c0_133, %c0_134] : memref<4x1x8xf32, #tpu.memory_space<vmem>>, vector<1x1x8xf32>
      %189 = vector.shape_cast %188 : vector<1x1x8xf32> to vector<1x8xf32>
      %190 = vector.broadcast %189 : vector<1x8xf32> to vector<8x8xf32>
      %191 = arith.addf %187, %190 : vector<8x8xf32>
      %192 = arith.truncf %184 : vector<8x8xf32> to vector<8x8xbf16>
      %c1_135 = arith.constant 1 : index
      %c0_136 = arith.constant 0 : index
      %c0_137 = arith.constant 0 : index
      %193 = vector.load %arg13[%c1_135, %c0_136, %c0_137] : memref<4x8x8xbf16, #tpu.memory_space<vmem>>, vector<1x8x8xbf16>
      %194 = vector.shape_cast %193 : vector<1x8x8xbf16> to vector<8x8xbf16>
      %195 = vector.shape_cast %192 : vector<8x8xbf16> to vector<1x8x8xbf16>
      tpu.vector_store %arg13[%c1_135, %c0_136, %c0_137], %195 {strides = array<i32>} : memref<4x8x8xbf16, #tpu.memory_space<vmem>>, vector<1x8x8xbf16>,
      %196 = arith.truncf %191 : vector<8x8xf32> to vector<8x8xbf16>
      %c1_138 = arith.constant 1 : index
      %c0_139 = arith.constant 0 : index
      %c0_140 = arith.constant 0 : index
      %197 = vector.load %arg14[%c1_138, %c0_139, %c0_140] : memref<4x8x8xbf16, #tpu.memory_space<vmem>>, vector<1x8x8xbf16>
      %198 = vector.shape_cast %197 : vector<1x8x8xbf16> to vector<8x8xbf16>
      %199 = vector.shape_cast %196 : vector<8x8xbf16> to vector<1x8x8xbf16>
      tpu.vector_store %arg14[%c1_138, %c0_139, %c0_140], %199 {strides = array<i32>} : memref<4x8x8xbf16, #tpu.memory_space<vmem>>, vector<1x8x8xbf16>,
      %c2_141 = arith.constant 2 : index
      %c0_142 = arith.constant 0 : index
      %c0_143 = arith.constant 0 : index
      %200 = vector.load %arg4[%c2_141, %c0_142, %c0_143] : memref<4x32x8xbf16, #tpu.memory_space<vmem>>, vector<1x32x8xbf16>
      %201 = vector.shape_cast %200 : vector<1x32x8xbf16> to vector<32x8xbf16>
      %cst_144 = arith.constant dense<0.000000e+00> : vector<8x8xf32>
      %202 = tpu.matmul %155, %201, %cst_144 {dimension_numbers = #tpu.dot_dimension_numbers<[1], [0], [0], [1], [0, 0, 1, 1], [], []>} : vector<8x32xbf16>, vector<32x8xbf16>, vector<8x8xf32> -> vector<8x8xf32>
      %c2_145 = arith.constant 2 : index
      %c0_146 = arith.constant 0 : index
      %c0_147 = arith.constant 0 : index
      %203 = vector.load %arg7[%c2_145, %c0_146, %c0_147] : memref<4x1x8xf32, #tpu.memory_space<vmem>>, vector<1x1x8xf32>
      %204 = vector.shape_cast %203 : vector<1x1x8xf32> to vector<1x8xf32>
      %205 = vector.broadcast %204 : vector<1x8xf32> to vector<8x8xf32>
      %206 = arith.addf %202, %205 : vector<8x8xf32>
      %c2_148 = arith.constant 2 : index
      %c0_149 = arith.constant 0 : index
      %c0_150 = arith.constant 0 : index
      %207 = vector.load %arg5[%c2_148, %c0_149, %c0_150] : memref<4x32x8xbf16, #tpu.memory_space<vmem>>, vector<1x32x8xbf16>
      %208 = vector.shape_cast %207 : vector<1x32x8xbf16> to vector<32x8xbf16>
      %cst_151 = arith.constant dense<0.000000e+00> : vector<8x8xf32>
      %209 = tpu.matmul %155, %208, %cst_151 {dimension_numbers = #tpu.dot_dimension_numbers<[1], [0], [0], [1], [0, 0, 1, 1], [], []>} : vector<8x32xbf16>, vector<32x8xbf16>, vector<8x8xf32> -> vector<8x8xf32>
      %c2_152 = arith.constant 2 : index
      %c0_153 = arith.constant 0 : index
      %c0_154 = arith.constant 0 : index
      %210 = vector.load %arg8[%c2_152, %c0_153, %c0_154] : memref<4x1x8xf32, #tpu.memory_space<vmem>>, vector<1x1x8xf32>
      %211 = vector.shape_cast %210 : vector<1x1x8xf32> to vector<1x8xf32>
      %212 = vector.broadcast %211 : vector<1x8xf32> to vector<8x8xf32>
      %213 = arith.addf %209, %212 : vector<8x8xf32>
      %214 = arith.truncf %206 : vector<8x8xf32> to vector<8x8xbf16>
      %c2_155 = arith.constant 2 : index
      %c0_156 = arith.constant 0 : index
      %c0_157 = arith.constant 0 : index
      %215 = vector.load %arg13[%c2_155, %c0_156, %c0_157] : memref<4x8x8xbf16, #tpu.memory_space<vmem>>, vector<1x8x8xbf16>
      %216 = vector.shape_cast %215 : vector<1x8x8xbf16> to vector<8x8xbf16>
      %217 = vector.shape_cast %214 : vector<8x8xbf16> to vector<1x8x8xbf16>
      tpu.vector_store %arg13[%c2_155, %c0_156, %c0_157], %217 {strides = array<i32>} : memref<4x8x8xbf16, #tpu.memory_space<vmem>>, vector<1x8x8xbf16>,
      %218 = arith.truncf %213 : vector<8x8xf32> to vector<8x8xbf16>
      %c2_158 = arith.constant 2 : index
      %c0_159 = arith.constant 0 : index
      %c0_160 = arith.constant 0 : index
      %219 = vector.load %arg14[%c2_158, %c0_159, %c0_160] : memref<4x8x8xbf16, #tpu.memory_space<vmem>>, vector<1x8x8xbf16>
      %220 = vector.shape_cast %219 : vector<1x8x8xbf16> to vector<8x8xbf16>
      %221 = vector.shape_cast %218 : vector<8x8xbf16> to vector<1x8x8xbf16>
      tpu.vector_store %arg14[%c2_158, %c0_159, %c0_160], %221 {strides = array<i32>} : memref<4x8x8xbf16, #tpu.memory_space<vmem>>, vector<1x8x8xbf16>,
      %c3_161 = arith.constant 3 : index
      %c0_162 = arith.constant 0 : index
      %c0_163 = arith.constant 0 : index
      %222 = vector.load %arg4[%c3_161, %c0_162, %c0_163] : memref<4x32x8xbf16, #tpu.memory_space<vmem>>, vector<1x32x8xbf16>
      %223 = vector.shape_cast %222 : vector<1x32x8xbf16> to vector<32x8xbf16>
      %cst_164 = arith.constant dense<0.000000e+00> : vector<8x8xf32>
      %224 = tpu.matmul %155, %223, %cst_164 {dimension_numbers = #tpu.dot_dimension_numbers<[1], [0], [0], [1], [0, 0, 1, 1], [], []>} : vector<8x32xbf16>, vector<32x8xbf16>, vector<8x8xf32> -> vector<8x8xf32>
      %c3_165 = arith.constant 3 : index
      %c0_166 = arith.constant 0 : index
      %c0_167 = arith.constant 0 : index
      %225 = vector.load %arg7[%c3_165, %c0_166, %c0_167] : memref<4x1x8xf32, #tpu.memory_space<vmem>>, vector<1x1x8xf32>
      %226 = vector.shape_cast %225 : vector<1x1x8xf32> to vector<1x8xf32>
      %227 = vector.broadcast %226 : vector<1x8xf32> to vector<8x8xf32>
      %228 = arith.addf %224, %227 : vector<8x8xf32>
      %c3_168 = arith.constant 3 : index
      %c0_169 = arith.constant 0 : index
      %c0_170 = arith.constant 0 : index
      %229 = vector.load %arg5[%c3_168, %c0_169, %c0_170] : memref<4x32x8xbf16, #tpu.memory_space<vmem>>, vector<1x32x8xbf16>
      %230 = vector.shape_cast %229 : vector<1x32x8xbf16> to vector<32x8xbf16>
      %cst_171 = arith.constant dense<0.000000e+00> : vector<8x8xf32>
      %231 = tpu.matmul %155, %230, %cst_171 {dimension_numbers = #tpu.dot_dimension_numbers<[1], [0], [0], [1], [0, 0, 1, 1], [], []>} : vector<8x32xbf16>, vector<32x8xbf16>, vector<8x8xf32> -> vector<8x8xf32>
      %c3_172 = arith.constant 3 : index
      %c0_173 = arith.constant 0 : index
      %c0_174 = arith.constant 0 : index
      %232 = vector.load %arg8[%c3_172, %c0_173, %c0_174] : memref<4x1x8xf32, #tpu.memory_space<vmem>>, vector<1x1x8xf32>
      %233 = vector.shape_cast %232 : vector<1x1x8xf32> to vector<1x8xf32>
      %234 = vector.broadcast %233 : vector<1x8xf32> to vector<8x8xf32>
      %235 = arith.addf %231, %234 : vector<8x8xf32>
      %236 = arith.truncf %228 : vector<8x8xf32> to vector<8x8xbf16>
      %c3_175 = arith.constant 3 : index
      %c0_176 = arith.constant 0 : index
      %c0_177 = arith.constant 0 : index
      %237 = vector.load %arg13[%c3_175, %c0_176, %c0_177] : memref<4x8x8xbf16, #tpu.memory_space<vmem>>, vector<1x8x8xbf16>
      %238 = vector.shape_cast %237 : vector<1x8x8xbf16> to vector<8x8xbf16>
      %239 = vector.shape_cast %236 : vector<8x8xbf16> to vector<1x8x8xbf16>
      tpu.vector_store %arg13[%c3_175, %c0_176, %c0_177], %239 {strides = array<i32>} : memref<4x8x8xbf16, #tpu.memory_space<vmem>>, vector<1x8x8xbf16>,
      %240 = arith.truncf %235 : vector<8x8xf32> to vector<8x8xbf16>
      %c3_178 = arith.constant 3 : index
      %c0_179 = arith.constant 0 : index
      %c0_180 = arith.constant 0 : index
      %241 = vector.load %arg14[%c3_178, %c0_179, %c0_180] : memref<4x8x8xbf16, #tpu.memory_space<vmem>>, vector<1x8x8xbf16>
      %242 = vector.shape_cast %241 : vector<1x8x8xbf16> to vector<8x8xbf16>
      %243 = vector.shape_cast %240 : vector<8x8xbf16> to vector<1x8x8xbf16>
      tpu.vector_store %arg14[%c3_178, %c0_179, %c0_180], %243 {strides = array<i32>} : memref<4x8x8xbf16, #tpu.memory_space<vmem>>, vector<1x8x8xbf16>,
      %cst_181 = arith.constant 0.000000e+00 : f32
      %244 = vector.broadcast %cst_181 : f32 to vector<1x8xf32>
      %c0_182 = arith.constant 0 : index
      %c0_183 = arith.constant 0 : index
      %c0_184 = arith.constant 0 : index
      %245 = vector.load %arg12[%c0_182, %c0_183, %c0_184] : memref<1x1x8xf32, #tpu.memory_space<vmem>>, vector<1x1x8xf32>
      %246 = vector.shape_cast %245 : vector<1x1x8xf32> to vector<1x8xf32>
      %247 = vector.shape_cast %244 : vector<1x8xf32> to vector<1x1x8xf32>
      tpu.vector_store %arg12[%c0_182, %c0_183, %c0_184], %247 {strides = array<i32>} : memref<1x1x8xf32, #tpu.memory_space<vmem>>, vector<1x1x8xf32>,
    } else {
    }
    %c8_i32 = arith.constant 8 : i32
    %3 = arith.muli %arg1, %c8_i32 : i32
    %4 = tpu.assume_multiple %3, 8 : i32
    %c0 = arith.constant 0 : index
    %5 = arith.index_cast %4 : i32 to index
    %c0_1 = arith.constant 0 : index
    %6 = vector.load %arg2[%c0, %5, %c0_1] : memref<1x8x32xf32, #tpu.memory_space<vmem>>, vector<1x8x32xf32>
    %7 = vector.shape_cast %6 : vector<1x8x32xf32> to vector<8x32xf32>
    %8 = arith.truncf %7 : vector<8x32xf32> to vector<8x32xbf16>
    %cst = arith.constant 0.000000e+00 : f32
    %9 = vector.broadcast %cst : f32 to vector<1x8xf32>
    %c0_2 = arith.constant 0 : index
    %c0_3 = arith.constant 0 : index
    %c0_4 = arith.constant 0 : index
    %10 = vector.load %arg3[%c0_2, %c0_3, %c0_4] : memref<4x32x8xbf16, #tpu.memory_space<vmem>>, vector<1x32x8xbf16>
    %11 = vector.shape_cast %10 : vector<1x32x8xbf16> to vector<32x8xbf16>
    %cst_5 = arith.constant dense<0.000000e+00> : vector<8x8xf32>
    %12 = tpu.matmul %8, %11, %cst_5 {dimension_numbers = #tpu.dot_dimension_numbers<[1], [0], [0], [1], [0, 0, 1, 1], [], []>} : vector<8x32xbf16>, vector<32x8xbf16>, vector<8x8xf32> -> vector<8x8xf32>
    %c0_6 = arith.constant 0 : index
    %c0_7 = arith.constant 0 : index
    %c0_8 = arith.constant 0 : index
    %13 = vector.load %arg6[%c0_6, %c0_7, %c0_8] : memref<4x1x8xf32, #tpu.memory_space<vmem>>, vector<1x1x8xf32>
    %14 = vector.shape_cast %13 : vector<1x1x8xf32> to vector<1x8xf32>
    %15 = vector.broadcast %14 : vector<1x8xf32> to vector<8x8xf32>
    %16 = arith.addf %12, %15 : vector<8x8xf32>
    %cst_9 = arith.constant 0.353553385 : f32
    %17 = vector.broadcast %cst_9 : f32 to vector<8x8xf32>
    %18 = arith.mulf %16, %17 : vector<8x8xf32>
    %19 = arith.truncf %18 : vector<8x8xf32> to vector<8x8xbf16>
    %c0_10 = arith.constant 0 : index
    %c0_11 = arith.constant 0 : index
    %c0_12 = arith.constant 0 : index
    %20 = vector.load %arg13[%c0_10, %c0_11, %c0_12] : memref<4x8x8xbf16, #tpu.memory_space<vmem>>, vector<1x8x8xbf16>
    %21 = vector.shape_cast %20 : vector<1x8x8xbf16> to vector<8x8xbf16>
    %cst_13 = arith.constant dense<0.000000e+00> : vector<8x8xf32>
    %22 = tpu.matmul %19, %21, %cst_13 {dimension_numbers = #tpu.dot_dimension_numbers<[1], [1], [0], [0], [0, 0, 1, 0], [], []>} : vector<8x8xbf16>, vector<8x8xbf16>, vector<8x8xf32> -> vector<8x8xf32>
    %cst_14 = arith.constant dense<0xFF800000> : vector<8xf32>
    %23 = vector.multi_reduction <maximumf>, %22, %cst_14 [1] : vector<8x8xf32> to vector<8xf32>
    %24 = vector.shape_cast %23 : vector<8xf32> to vector<8x1xf32>
    %25 = vector.broadcast %24 : vector<8x1xf32> to vector<8x8xf32>
    %26 = arith.subf %22, %25 : vector<8x8xf32>
    %27 = math.exp %26 : vector<8x8xf32>
    %cst_15 = arith.constant dense<0.000000e+00> : vector<8xf32>
    %28 = vector.multi_reduction <add>, %27, %cst_15 [1] : vector<8x8xf32> to vector<8xf32>
    %29 = vector.shape_cast %28 : vector<8xf32> to vector<8x1xf32>
    %30 = tpu.reciprocal %29 {approx = true} : vector<8x1xf32> -> vector<8x1xf32>
    %31 = vector.broadcast %30 : vector<8x1xf32> to vector<8x8xf32>
    %32 = arith.mulf %27, %31 : vector<8x8xf32>
    %cst_16 = arith.constant dense<0.000000e+00> : vector<8xf32>
    %33 = vector.multi_reduction <add>, %32, %cst_16 [0] : vector<8x8xf32> to vector<8xf32>
    %34 = vector.shape_cast %33 : vector<8xf32> to vector<1x8xf32>
    %35 = arith.addf %9, %34 : vector<1x8xf32>
    %36 = arith.truncf %32 : vector<8x8xf32> to vector<8x8xbf16>
    %c0_17 = arith.constant 0 : index
    %c0_18 = arith.constant 0 : index
    %c0_19 = arith.constant 0 : index
    %37 = vector.load %arg14[%c0_17, %c0_18, %c0_19] : memref<4x8x8xbf16, #tpu.memory_space<vmem>>, vector<1x8x8xbf16>
    %38 = vector.shape_cast %37 : vector<1x8x8xbf16> to vector<8x8xbf16>
    %cst_20 = arith.constant dense<0.000000e+00> : vector<8x8xf32>
    %39 = tpu.matmul %36, %38, %cst_20 {dimension_numbers = #tpu.dot_dimension_numbers<[1], [0], [0], [1], [0, 0, 1, 1], [], []>} : vector<8x8xbf16>, vector<8x8xbf16>, vector<8x8xf32> -> vector<8x8xf32>
    %c0_21 = arith.constant 0 : index
    %c0_22 = arith.constant 0 : index
    %40 = vector.load %arg15[%c0_21, %c0_22] : memref<8x32xf32, #tpu.memory_space<vmem>>, vector<8x8xf32>
    tpu.vector_store %arg15[%c0_21, %c0_22], %39 {strides = array<i32>} : memref<8x32xf32, #tpu.memory_space<vmem>>, vector<8x8xf32>,
    %c1 = arith.constant 1 : index
    %c0_23 = arith.constant 0 : index
    %c0_24 = arith.constant 0 : index
    %41 = vector.load %arg3[%c1, %c0_23, %c0_24] : memref<4x32x8xbf16, #tpu.memory_space<vmem>>, vector<1x32x8xbf16>
    %42 = vector.shape_cast %41 : vector<1x32x8xbf16> to vector<32x8xbf16>
    %cst_25 = arith.constant dense<0.000000e+00> : vector<8x8xf32>
    %43 = tpu.matmul %8, %42, %cst_25 {dimension_numbers = #tpu.dot_dimension_numbers<[1], [0], [0], [1], [0, 0, 1, 1], [], []>} : vector<8x32xbf16>, vector<32x8xbf16>, vector<8x8xf32> -> vector<8x8xf32>
    %c1_26 = arith.constant 1 : index
    %c0_27 = arith.constant 0 : index
    %c0_28 = arith.constant 0 : index
    %44 = vector.load %arg6[%c1_26, %c0_27, %c0_28] : memref<4x1x8xf32, #tpu.memory_space<vmem>>, vector<1x1x8xf32>
    %45 = vector.shape_cast %44 : vector<1x1x8xf32> to vector<1x8xf32>
    %46 = vector.broadcast %45 : vector<1x8xf32> to vector<8x8xf32>
    %47 = arith.addf %43, %46 : vector<8x8xf32>
    %cst_29 = arith.constant 0.353553385 : f32
    %48 = vector.broadcast %cst_29 : f32 to vector<8x8xf32>
    %49 = arith.mulf %47, %48 : vector<8x8xf32>
    %50 = arith.truncf %49 : vector<8x8xf32> to vector<8x8xbf16>
    %c1_30 = arith.constant 1 : index
    %c0_31 = arith.constant 0 : index
    %c0_32 = arith.constant 0 : index
    %51 = vector.load %arg13[%c1_30, %c0_31, %c0_32] : memref<4x8x8xbf16, #tpu.memory_space<vmem>>, vector<1x8x8xbf16>
    %52 = vector.shape_cast %51 : vector<1x8x8xbf16> to vector<8x8xbf16>
    %cst_33 = arith.constant dense<0.000000e+00> : vector<8x8xf32>
    %53 = tpu.matmul %50, %52, %cst_33 {dimension_numbers = #tpu.dot_dimension_numbers<[1], [1], [0], [0], [0, 0, 1, 0], [], []>} : vector<8x8xbf16>, vector<8x8xbf16>, vector<8x8xf32> -> vector<8x8xf32>
    %cst_34 = arith.constant dense<0xFF800000> : vector<8xf32>
    %54 = vector.multi_reduction <maximumf>, %53, %cst_34 [1] : vector<8x8xf32> to vector<8xf32>
    %55 = vector.shape_cast %54 : vector<8xf32> to vector<8x1xf32>
    %56 = vector.broadcast %55 : vector<8x1xf32> to vector<8x8xf32>
    %57 = arith.subf %53, %56 : vector<8x8xf32>
    %58 = math.exp %57 : vector<8x8xf32>
    %cst_35 = arith.constant dense<0.000000e+00> : vector<8xf32>
    %59 = vector.multi_reduction <add>, %58, %cst_35 [1] : vector<8x8xf32> to vector<8xf32>
    %60 = vector.shape_cast %59 : vector<8xf32> to vector<8x1xf32>
    %61 = tpu.reciprocal %60 {approx = true} : vector<8x1xf32> -> vector<8x1xf32>
    %62 = vector.broadcast %61 : vector<8x1xf32> to vector<8x8xf32>
    %63 = arith.mulf %58, %62 : vector<8x8xf32>
    %cst_36 = arith.constant dense<0.000000e+00> : vector<8xf32>
    %64 = vector.multi_reduction <add>, %63, %cst_36 [0] : vector<8x8xf32> to vector<8xf32>
    %65 = vector.shape_cast %64 : vector<8xf32> to vector<1x8xf32>
    %66 = arith.addf %35, %65 : vector<1x8xf32>
    %67 = arith.truncf %63 : vector<8x8xf32> to vector<8x8xbf16>
    %c1_37 = arith.constant 1 : index
    %c0_38 = arith.constant 0 : index
    %c0_39 = arith.constant 0 : index
    %68 = vector.load %arg14[%c1_37, %c0_38, %c0_39] : memref<4x8x8xbf16, #tpu.memory_space<vmem>>, vector<1x8x8xbf16>
    %69 = vector.shape_cast %68 : vector<1x8x8xbf16> to vector<8x8xbf16>
    %cst_40 = arith.constant dense<0.000000e+00> : vector<8x8xf32>
    %70 = tpu.matmul %67, %69, %cst_40 {dimension_numbers = #tpu.dot_dimension_numbers<[1], [0], [0], [1], [0, 0, 1, 1], [], []>} : vector<8x8xbf16>, vector<8x8xbf16>, vector<8x8xf32> -> vector<8x8xf32>
    %c0_41 = arith.constant 0 : index
    %c8 = arith.constant 8 : index
    %71 = vector.load %arg15[%c0_41, %c8] : memref<8x32xf32, #tpu.memory_space<vmem>>, vector<8x8xf32>
    tpu.vector_store %arg15[%c0_41, %c8], %70 {strides = array<i32>} : memref<8x32xf32, #tpu.memory_space<vmem>>, vector<8x8xf32>,
    %c2 = arith.constant 2 : index
    %c0_42 = arith.constant 0 : index
    %c0_43 = arith.constant 0 : index
    %72 = vector.load %arg3[%c2, %c0_42, %c0_43] : memref<4x32x8xbf16, #tpu.memory_space<vmem>>, vector<1x32x8xbf16>
    %73 = vector.shape_cast %72 : vector<1x32x8xbf16> to vector<32x8xbf16>
    %cst_44 = arith.constant dense<0.000000e+00> : vector<8x8xf32>
    %74 = tpu.matmul %8, %73, %cst_44 {dimension_numbers = #tpu.dot_dimension_numbers<[1], [0], [0], [1], [0, 0, 1, 1], [], []>} : vector<8x32xbf16>, vector<32x8xbf16>, vector<8x8xf32> -> vector<8x8xf32>
    %c2_45 = arith.constant 2 : index
    %c0_46 = arith.constant 0 : index
    %c0_47 = arith.constant 0 : index
    %75 = vector.load %arg6[%c2_45, %c0_46, %c0_47] : memref<4x1x8xf32, #tpu.memory_space<vmem>>, vector<1x1x8xf32>
    %76 = vector.shape_cast %75 : vector<1x1x8xf32> to vector<1x8xf32>
    %77 = vector.broadcast %76 : vector<1x8xf32> to vector<8x8xf32>
    %78 = arith.addf %74, %77 : vector<8x8xf32>
    %cst_48 = arith.constant 0.353553385 : f32
    %79 = vector.broadcast %cst_48 : f32 to vector<8x8xf32>
    %80 = arith.mulf %78, %79 : vector<8x8xf32>
    %81 = arith.truncf %80 : vector<8x8xf32> to vector<8x8xbf16>
    %c2_49 = arith.constant 2 : index
    %c0_50 = arith.constant 0 : index
    %c0_51 = arith.constant 0 : index
    %82 = vector.load %arg13[%c2_49, %c0_50, %c0_51] : memref<4x8x8xbf16, #tpu.memory_space<vmem>>, vector<1x8x8xbf16>
    %83 = vector.shape_cast %82 : vector<1x8x8xbf16> to vector<8x8xbf16>
    %cst_52 = arith.constant dense<0.000000e+00> : vector<8x8xf32>
    %84 = tpu.matmul %81, %83, %cst_52 {dimension_numbers = #tpu.dot_dimension_numbers<[1], [1], [0], [0], [0, 0, 1, 0], [], []>} : vector<8x8xbf16>, vector<8x8xbf16>, vector<8x8xf32> -> vector<8x8xf32>
    %cst_53 = arith.constant dense<0xFF800000> : vector<8xf32>
    %85 = vector.multi_reduction <maximumf>, %84, %cst_53 [1] : vector<8x8xf32> to vector<8xf32>
    %86 = vector.shape_cast %85 : vector<8xf32> to vector<8x1xf32>
    %87 = vector.broadcast %86 : vector<8x1xf32> to vector<8x8xf32>
    %88 = arith.subf %84, %87 : vector<8x8xf32>
    %89 = math.exp %88 : vector<8x8xf32>
    %cst_54 = arith.constant dense<0.000000e+00> : vector<8xf32>
    %90 = vector.multi_reduction <add>, %89, %cst_54 [1] : vector<8x8xf32> to vector<8xf32>
    %91 = vector.shape_cast %90 : vector<8xf32> to vector<8x1xf32>
    %92 = tpu.reciprocal %91 {approx = true} : vector<8x1xf32> -> vector<8x1xf32>
    %93 = vector.broadcast %92 : vector<8x1xf32> to vector<8x8xf32>
    %94 = arith.mulf %89, %93 : vector<8x8xf32>
    %cst_55 = arith.constant dense<0.000000e+00> : vector<8xf32>
    %95 = vector.multi_reduction <add>, %94, %cst_55 [0] : vector<8x8xf32> to vector<8xf32>
    %96 = vector.shape_cast %95 : vector<8xf32> to vector<1x8xf32>
    %97 = arith.addf %66, %96 : vector<1x8xf32>
    %98 = arith.truncf %94 : vector<8x8xf32> to vector<8x8xbf16>
    %c2_56 = arith.constant 2 : index
    %c0_57 = arith.constant 0 : index
    %c0_58 = arith.constant 0 : index
    %99 = vector.load %arg14[%c2_56, %c0_57, %c0_58] : memref<4x8x8xbf16, #tpu.memory_space<vmem>>, vector<1x8x8xbf16>
    %100 = vector.shape_cast %99 : vector<1x8x8xbf16> to vector<8x8xbf16>
    %cst_59 = arith.constant dense<0.000000e+00> : vector<8x8xf32>
    %101 = tpu.matmul %98, %100, %cst_59 {dimension_numbers = #tpu.dot_dimension_numbers<[1], [0], [0], [1], [0, 0, 1, 1], [], []>} : vector<8x8xbf16>, vector<8x8xbf16>, vector<8x8xf32> -> vector<8x8xf32>
    %c0_60 = arith.constant 0 : index
    %c16 = arith.constant 16 : index
    %102 = vector.load %arg15[%c0_60, %c16] : memref<8x32xf32, #tpu.memory_space<vmem>>, vector<8x8xf32>
    tpu.vector_store %arg15[%c0_60, %c16], %101 {strides = array<i32>} : memref<8x32xf32, #tpu.memory_space<vmem>>, vector<8x8xf32>,
    %c3 = arith.constant 3 : index
    %c0_61 = arith.constant 0 : index
    %c0_62 = arith.constant 0 : index
    %103 = vector.load %arg3[%c3, %c0_61, %c0_62] : memref<4x32x8xbf16, #tpu.memory_space<vmem>>, vector<1x32x8xbf16>
    %104 = vector.shape_cast %103 : vector<1x32x8xbf16> to vector<32x8xbf16>
    %cst_63 = arith.constant dense<0.000000e+00> : vector<8x8xf32>
    %105 = tpu.matmul %8, %104, %cst_63 {dimension_numbers = #tpu.dot_dimension_numbers<[1], [0], [0], [1], [0, 0, 1, 1], [], []>} : vector<8x32xbf16>, vector<32x8xbf16>, vector<8x8xf32> -> vector<8x8xf32>
    %c3_64 = arith.constant 3 : index
    %c0_65 = arith.constant 0 : index
    %c0_66 = arith.constant 0 : index
    %106 = vector.load %arg6[%c3_64, %c0_65, %c0_66] : memref<4x1x8xf32, #tpu.memory_space<vmem>>, vector<1x1x8xf32>
    %107 = vector.shape_cast %106 : vector<1x1x8xf32> to vector<1x8xf32>
    %108 = vector.broadcast %107 : vector<1x8xf32> to vector<8x8xf32>
    %109 = arith.addf %105, %108 : vector<8x8xf32>
    %cst_67 = arith.constant 0.353553385 : f32
    %110 = vector.broadcast %cst_67 : f32 to vector<8x8xf32>
    %111 = arith.mulf %109, %110 : vector<8x8xf32>
    %112 = arith.truncf %111 : vector<8x8xf32> to vector<8x8xbf16>
    %c3_68 = arith.constant 3 : index
    %c0_69 = arith.constant 0 : index
    %c0_70 = arith.constant 0 : index
    %113 = vector.load %arg13[%c3_68, %c0_69, %c0_70] : memref<4x8x8xbf16, #tpu.memory_space<vmem>>, vector<1x8x8xbf16>
    %114 = vector.shape_cast %113 : vector<1x8x8xbf16> to vector<8x8xbf16>
    %cst_71 = arith.constant dense<0.000000e+00> : vector<8x8xf32>
    %115 = tpu.matmul %112, %114, %cst_71 {dimension_numbers = #tpu.dot_dimension_numbers<[1], [1], [0], [0], [0, 0, 1, 0], [], []>} : vector<8x8xbf16>, vector<8x8xbf16>, vector<8x8xf32> -> vector<8x8xf32>
    %cst_72 = arith.constant dense<0xFF800000> : vector<8xf32>
    %116 = vector.multi_reduction <maximumf>, %115, %cst_72 [1] : vector<8x8xf32> to vector<8xf32>
    %117 = vector.shape_cast %116 : vector<8xf32> to vector<8x1xf32>
    %118 = vector.broadcast %117 : vector<8x1xf32> to vector<8x8xf32>
    %119 = arith.subf %115, %118 : vector<8x8xf32>
    %120 = math.exp %119 : vector<8x8xf32>
    %cst_73 = arith.constant dense<0.000000e+00> : vector<8xf32>
    %121 = vector.multi_reduction <add>, %120, %cst_73 [1] : vector<8x8xf32> to vector<8xf32>
    %122 = vector.shape_cast %121 : vector<8xf32> to vector<8x1xf32>
    %123 = tpu.reciprocal %122 {approx = true} : vector<8x1xf32> -> vector<8x1xf32>
    %124 = vector.broadcast %123 : vector<8x1xf32> to vector<8x8xf32>
    %125 = arith.mulf %120, %124 : vector<8x8xf32>
    %cst_74 = arith.constant dense<0.000000e+00> : vector<8xf32>
    %126 = vector.multi_reduction <add>, %125, %cst_74 [0] : vector<8x8xf32> to vector<8xf32>
    %127 = vector.shape_cast %126 : vector<8xf32> to vector<1x8xf32>
    %128 = arith.addf %97, %127 : vector<1x8xf32>
    %129 = arith.truncf %125 : vector<8x8xf32> to vector<8x8xbf16>
    %c3_75 = arith.constant 3 : index
    %c0_76 = arith.constant 0 : index
    %c0_77 = arith.constant 0 : index
    %130 = vector.load %arg14[%c3_75, %c0_76, %c0_77] : memref<4x8x8xbf16, #tpu.memory_space<vmem>>, vector<1x8x8xbf16>
    %131 = vector.shape_cast %130 : vector<1x8x8xbf16> to vector<8x8xbf16>
    %cst_78 = arith.constant dense<0.000000e+00> : vector<8x8xf32>
    %132 = tpu.matmul %129, %131, %cst_78 {dimension_numbers = #tpu.dot_dimension_numbers<[1], [0], [0], [1], [0, 0, 1, 1], [], []>} : vector<8x8xbf16>, vector<8x8xbf16>, vector<8x8xf32> -> vector<8x8xf32>
    %c0_79 = arith.constant 0 : index
    %c24 = arith.constant 24 : index
    %133 = vector.load %arg15[%c0_79, %c24] : memref<8x32xf32, #tpu.memory_space<vmem>>, vector<8x8xf32>
    tpu.vector_store %arg15[%c0_79, %c24], %132 {strides = array<i32>} : memref<8x32xf32, #tpu.memory_space<vmem>>, vector<8x8xf32>,
    %c0_80 = arith.constant 0 : index
    %c0_81 = arith.constant 0 : index
    %134 = vector.load %arg15[%c0_80, %c0_81] : memref<8x32xf32, #tpu.memory_space<vmem>>, vector<8x32xf32>
    %135 = arith.truncf %134 : vector<8x32xf32> to vector<8x32xbf16>
    %c0_82 = arith.constant 0 : index
    %c0_83 = arith.constant 0 : index
    %136 = vector.load %arg9[%c0_82, %c0_83] : memref<32x32xbf16, #tpu.memory_space<vmem>>, vector<32x32xbf16>
    %cst_84 = arith.constant dense<0.000000e+00> : vector<8x32xf32>
    %137 = tpu.matmul %135, %136, %cst_84 {dimension_numbers = #tpu.dot_dimension_numbers<[1], [0], [0], [1], [0, 0, 1, 1], [], []>} : vector<8x32xbf16>, vector<32x32xbf16>, vector<8x32xf32> -> vector<8x32xf32>
    %c0_85 = arith.constant 0 : index
    %c0_86 = arith.constant 0 : index
    %138 = vector.load %arg10[%c0_85, %c0_86] : memref<1x32xf32, #tpu.memory_space<vmem>>, vector<1x32xf32>
    %139 = vector.broadcast %138 : vector<1x32xf32> to vector<8x32xf32>
    %140 = arith.addf %137, %139 : vector<8x32xf32>
    %c0_87 = arith.constant 0 : index
    %c0_88 = arith.constant 0 : index
    %c0_89 = arith.constant 0 : index
    %141 = vector.load %arg11[%c0_87, %c0_88, %c0_89] : memref<1x8x32xf32, #tpu.memory_space<vmem>>, vector<1x8x32xf32>
    %142 = vector.shape_cast %141 : vector<1x8x32xf32> to vector<8x32xf32>
    %143 = vector.shape_cast %140 : vector<8x32xf32> to vector<1x8x32xf32>
    tpu.vector_store %arg11[%c0_87, %c0_88, %c0_89], %143 {strides = array<i32>} : memref<1x8x32xf32, #tpu.memory_space<vmem>>, vector<1x8x32xf32>,
    %c0_90 = arith.constant 0 : index
    %c0_91 = arith.constant 0 : index
    %c0_92 = arith.constant 0 : index
    %144 = vector.load %arg12[%c0_90, %c0_91, %c0_92] : memref<1x1x8xf32, #tpu.memory_space<vmem>>, vector<1x1x8xf32>
    %145 = vector.shape_cast %144 : vector<1x1x8xf32> to vector<1x8xf32>
    %146 = arith.addf %145, %128 : vector<1x8xf32>
    %c0_93 = arith.constant 0 : index
    %c0_94 = arith.constant 0 : index
    %c0_95 = arith.constant 0 : index
    %147 = vector.load %arg12[%c0_93, %c0_94, %c0_95] : memref<1x1x8xf32, #tpu.memory_space<vmem>>, vector<1x1x8xf32>
    %148 = vector.shape_cast %147 : vector<1x1x8xf32> to vector<1x8xf32>
    %149 = vector.shape_cast %146 : vector<1x8xf32> to vector<1x1x8xf32>
    tpu.vector_store %arg12[%c0_93, %c0_94, %c0_95], %149 {strides = array<i32>} : memref<1x1x8xf32, #tpu.memory_space<vmem>>, vector<1x1x8xf32>,
    %c0_i32_96 = arith.constant 0 : i32
    %150 = arith.cmpi eq, %arg1, %c0_i32_96 : i32
    %151 = arith.extui %150 : i1 to i32
    %c0_i32_97 = arith.constant 0 : i32
    %152 = arith.cmpi ne, %151, %c0_i32_97 : i32
    scf.if %152 {
      %c0_98 = arith.constant 0 : index
      %c0_99 = arith.constant 0 : index
      %c0_100 = arith.constant 0 : index
      %153 = vector.load %arg12[%c0_98, %c0_99, %c0_100] : memref<1x1x8xf32, #tpu.memory_space<vmem>>, vector<1x1x8xf32>
      %154 = vector.shape_cast %153 : vector<1x1x8xf32> to vector<1x8xf32>
      %cst_101 = arith.constant 3.125000e-02 : f32
      %155 = vector.broadcast %cst_101 : f32 to vector<1x8xf32>
      %156 = arith.mulf %154, %155 : vector<1x8xf32>
      %c0_102 = arith.constant 0 : index
      %c0_103 = arith.constant 0 : index
      %c0_104 = arith.constant 0 : index
      %157 = vector.load %arg12[%c0_102, %c0_103, %c0_104] : memref<1x1x8xf32, #tpu.memory_space<vmem>>, vector<1x1x8xf32>
      %158 = vector.shape_cast %157 : vector<1x1x8xf32> to vector<1x8xf32>
      %159 = vector.shape_cast %156 : vector<1x8xf32> to vector<1x1x8xf32>
      tpu.vector_store %arg12[%c0_102, %c0_103, %c0_104], %159 {strides = array<i32>} : memref<1x1x8xf32, #tpu.memory_space<vmem>>, vector<1x1x8xf32>,
    } else {
    }
    return
  }
  func.func @transform_0(%arg0: i32, %arg1: i32) -> (i32, i32, i32) {
    %c0_i32 = arith.constant 0 : i32
    %c0_i32_0 = arith.constant 0 : i32
    %c0_i32_1 = arith.constant 0 : i32
    return %arg0, %c0_i32, %c0_i32_0 : i32, i32, i32
  }
  func.func @transform_1(%arg0: i32, %arg1: i32) -> (i32, i32, i32) {
    %c0_i32 = arith.constant 0 : i32
    %c0_i32_0 = arith.constant 0 : i32
    %c0_i32_1 = arith.constant 0 : i32
    %c0_i32_2 = arith.constant 0 : i32
    return %c0_i32, %c0_i32_0, %c0_i32_1 : i32, i32, i32
  }
  func.func @transform_2(%arg0: i32, %arg1: i32) -> (i32, i32, i32) {
    %c0_i32 = arith.constant 0 : i32
    %c0_i32_0 = arith.constant 0 : i32
    %c0_i32_1 = arith.constant 0 : i32
    %c0_i32_2 = arith.constant 0 : i32
    return %c0_i32, %c0_i32_0, %c0_i32_1 : i32, i32, i32
  }
  func.func @transform_3(%arg0: i32, %arg1: i32) -> (i32, i32, i32) {
    %c0_i32 = arith.constant 0 : i32
    %c0_i32_0 = arith.constant 0 : i32
    %c0_i32_1 = arith.constant 0 : i32
    %c0_i32_2 = arith.constant 0 : i32
    return %c0_i32, %c0_i32_0, %c0_i32_1 : i32, i32, i32
  }
  func.func @transform_4(%arg0: i32, %arg1: i32) -> (i32, i32, i32) {
    %c0_i32 = arith.constant 0 : i32
    %c0_i32_0 = arith.constant 0 : i32
    %c0_i32_1 = arith.constant 0 : i32
    %c0_i32_2 = arith.constant 0 : i32
    return %c0_i32, %c0_i32_0, %c0_i32_1 : i32, i32, i32
  }
  func.func @transform_5(%arg0: i32, %arg1: i32) -> (i32, i32, i32) {
    %c0_i32 = arith.constant 0 : i32
    %c0_i32_0 = arith.constant 0 : i32
    %c0_i32_1 = arith.constant 0 : i32
    %c0_i32_2 = arith.constant 0 : i32
    return %c0_i32, %c0_i32_0, %c0_i32_1 : i32, i32, i32
  }
  func.func @transform_6(%arg0: i32, %arg1: i32) -> (i32, i32, i32) {
    %c0_i32 = arith.constant 0 : i32
    %c0_i32_0 = arith.constant 0 : i32
    %c0_i32_1 = arith.constant 0 : i32
    %c0_i32_2 = arith.constant 0 : i32
    return %c0_i32, %c0_i32_0, %c0_i32_1 : i32, i32, i32
  }
  func.func @transform_7(%arg0: i32, %arg1: i32) -> (i32, i32) {
    %c0_i32 = arith.constant 0 : i32
    %c0_i32_0 = arith.constant 0 : i32
    %c0_i32_1 = arith.constant 0 : i32
    return %c0_i32, %c0_i32_0 : i32, i32
  }
  func.func @transform_8(%arg0: i32, %arg1: i32) -> (i32, i32) {
    %c0_i32 = arith.constant 0 : i32
    %c0_i32_0 = arith.constant 0 : i32
    %c0_i32_1 = arith.constant 0 : i32
    return %c0_i32, %c0_i32_0 : i32, i32
  }
  func.func @transform_9(%arg0: i32, %arg1: i32) -> (i32, i32, i32) {
    %c0_i32 = arith.constant 0 : i32
    %c0_i32_0 = arith.constant 0 : i32
    return %arg0, %arg1, %c0_i32 : i32, i32, i32
  }
  func.func @transform_10(%arg0: i32, %arg1: i32) -> (i32, i32, i32) {
    %c0_i32 = arith.constant 0 : i32
    %c0_i32_0 = arith.constant 0 : i32
    %c0_i32_1 = arith.constant 0 : i32
    return %arg0, %c0_i32, %c0_i32_0 : i32, i32, i32
  }
}

</mosaic_0001>

<bundles_post_ra>
// kernel: multihead_attention.1
= control target key start
LH: loop header
LB: loop body
LE: loop exit
PB: predicated region body
PF: predicated region fallthrough
CT: control target
= control target key end

     0   :  { %s2901_s0 = inlined_call_operand.vmem [shape: f32[2,8,32], index: 0, kind: input, shape index: {}]   ;;  %s2902_s1 = inlined_call_operand.vmem [shape: bf16[4,32,8], index: 1, kind: input, shape index: {}]   ;;  %s2903_s2 = inlined_call_operand.vmem [shape: bf16[4,32,8], index: 2, kind: input, shape index: {}]   ;;  %s2904_s3 = inlined_call_operand.vmem [shape: bf16[4,32,8], index: 3, kind: input, shape index: {}]   ;;  %s2905_s4 = inlined_call_operand.vmem [shape: f32[4,1,8], index: 4, kind: input, shape index: {}]   ;;  %s2906_s5 = inlined_call_operand.vmem [shape: f32[4,1,8], index: 5, kind: input, shape index: {}]   ;;  %s2907_s6 = inlined_call_operand.vmem [shape: f32[4,1,8], index: 6, kind: input, shape index: {}]   ;;  %s2908_s7 = inlined_call_operand.vmem [shape: bf16[32,32], index: 7, kind: input, shape index: {}]   ;;  %s2909_s8 = inlined_call_operand.vmem [shape: f32[1,32], index: 8, kind: input, shape index: {}]   ;;  %s2910_s9 = inlined_call_operand.hbm [shape: f32[2,8,32], index: 9, kind: output, shape index: {0}]   ;;  %s2911_s10 = inlined_call_operand.hbm [shape: f32[2,1,8], index: 10, kind: output, shape index: {1}]  }
   0x1   :  { %2912 = sst [smem:[#allocation11_spill]] %s2901_s0 }
   0x2   :  { %2913 = sst [smem:[#allocation12_spill]] %s2902_s1 }
   0x3   :  { %2914 = sst [smem:[#allocation13_spill]] %s2903_s2 }
   0x4   :  { %2915 = sst [smem:[#allocation14_spill]] %s2904_s3 }
   0x5   :  { %16 = vsyncpa [#allocation6], 0 }
   0x6   :  { %18 = vsyncpa [#allocation6 + $0x1], 0 }
   0x7   :  { %19 = vsyncpa [#allocation8], 0 }
   0x8   :  { %21 = vsyncpa [#allocation8 + $0x1], 0  ;;  %s2498_s13 = smov 0   ;;  %s2500_s14 = smov 0  }
   0x9   :  { %s2502_s15 = smov 0   ;;  %s2504_s16 = smov 0  }
   0xa   :  { %s2506_s17 = smov 0   ;;  %s2508_s18 = smov 0  }
   0xb LB: > { %s1897_s19 = sadd.s32 4294967295, %s2434_s18   ;;  %s1898_s20 = sadd.s32 4294967294, %s2434_s18   ;;  %s2434_s18 = sphi %s2508_s18, %s27_s18   ;;  %s2430_s17 = sphi %s2506_s17, %s2926_s17   ;;  %s2426_s16 = sphi %s2504_s16, %s2925_s16   ;;  %s2422_s15 = sphi %s2502_s15, %s2924_s15   ;;  %s2418_s14 = sphi %s2500_s14, %s2923_s14   ;;  %s2414_s13 = sphi %s2498_s13, %s2922_s13  }
   0xc   : > { %s39_s21 = sadd.s32 1, %s2430_s17  ;;  %s242_s22 = sadd.s32 1, %s2422_s15 }
   0xd   : > { %p41_p0 = scmp.ge.s32.totalorder %s39_s21, 2  ;;  %p252_p1 = scmp.ne.s32.totalorder %s2422_s15, %s2418_s14 }
   0xe   : > { %p253_p2 = scmp.eq.s32.totalorder %s1897_s19, 1  ;;  %p258_p3 = scmp.ne.s32.totalorder %s2418_s14, %s2414_s13 }
   0xf   : > { %s2928_s21 = smov (%p41_p0, %s39_s21), 0  ;;  %p259_p5 = scmp.eq.s32.totalorder %s1898_s20, 1 }
  0x10   : > { %p2538_p4 = por %p253_p2, %p252_p1  ;;  %s237_s24 = ssub.s32 %s2430_s17, %s2928_s21 }
  0x11   : > { %p1901_p6 = scmp.ge.s32.totalorder %s2434_s18, 1  ;;  %p240_p7 = scmp.eq.s32.totalorder %s237_s24, 0 }
  0x12   : > { %p2545_p8 = por %p259_p5, %p258_p3  ;;  %p334_p9 = scmp.lt.s32.totalorder %s2434_s18, 3 }
  0x13   : > { %s2551_s26 = scalar_select %p240_p7, %s2422_s15, %s242_s22  }
  0x14   : > { %p335_p10 = pnand %p1901_p6, %p334_p9 }
  0x15   : > { %s2918_s2 = sld [smem:[#allocation13_spill]] (!%p335_p10)  ;;  %p375_p11 = scmp.lt.s32.totalorder (!%p335_p10), %s2426_s16, 1 }
  0x16   : > { %338 = sbr.rel (%p335_p10) target bundleno = 2846 (0xb1e), region = 56  ;;  %s2919_s0 = sld [smem:[#allocation11_spill]] (!%p335_p10) }
  0x17   : > { %s2920_s3 = sld [smem:[#allocation14_spill]] (!%p335_p10)  ;;  %s2438_s20 = smov (!%p335_p10), 8  }
  0x18   : > { %s2921_s1 = sld [smem:[#allocation12_spill]] (!%p335_p10)  ;;  %s2803_s24 = sand.u32 (!%p335_p10), 1, %s2418_s14  }
  0x19   : > { %s2806_s27 = scalar_lea.vmem (!%p335_p10), [#allocation7], %s2803_s24  ;;  %s2011_s19 = sshll.u32 (!%p335_p10), %s2426_s16, 4 }
  0x1a   : > { %s1797_s29 = scalar_lea.hbm (!%p335_p10), %s2911_s10, %s2011_s19  ;;  %s1773_s30 = scalar_lea.sflag (!%p335_p10), [#allocation8], %s2803_s24 }
  0x1b   : > { %v2286_v0 = vld [vmem:[%s2918_s2 + $0x8] sm:$0xff]   ;;  %v2436_v1 = vmov 0.0   ;;  %v2287_v2 = vld [vmem:[%s2918_s2] sm:$0xff]   ;;  %vm2437_vm0 = vmmov 0   ;;  %s376_s11 = scalar_select %p375_p11, %s2426_s16, 1  ;;  %vm409_vm1 = vcmask 261120  }
  0x1c   : > { %2069 = vmatprep.subr.bf16.mxu0 %v2436_v1  ;;  %2077 = vmatprep.subr.bf16.mxu1 %v2436_v1  ;;  %v2288_v4 = vld [vmem:[%s2918_s2 + $0x18] sm:$0xff]   ;;  %v2289_v7 = vld [vmem:[%s2918_s2 + $0x10] sm:$0xff]   ;;  %v2290_v9 = vld [vmem:[%s2918_s2 + $0x28] sm:$0xff]   ;;  %vm517_vm2 = vcmask 60416   ;;  %vm1005_vm3 = vcmask 64512   ;;  %vm1076_vm4 = vcmask 1043456  }
  0x1d   : > { %2070 = vmatpush3.bf16.msra.mxu0 %v2286_v0  ;;  %2073 = vmatprep.mubr.msk.bf16.mxu0 %vm2437_vm0, %v2436_v1  ;;  %s1903_s12 = sshll.u32 %s376_s11, 3  ;;  %v2296_v6 = vld [vmem:[%s2920_s3 + $0x8] sm:$0xff]   ;;  %v2297_v8 = vld [vmem:[%s2920_s3] sm:$0xff]   ;;  %v2298_v10 = vld [vmem:[%s2920_s3 + $0x18] sm:$0xff]   ;;  %vm1308_vm5 = vcmask 130112   ;;  %vm929_vm6 = vcmask 57344  }
  0x1e   : > { %2071 = vmatprep.subr.bf16.mxu0 %v2436_v1  ;;  %2081 = vmatprep.mubr.msk.bf16.mxu1 %vm2437_vm0, %v2436_v1  ;;  %s378_s22 = scalar_lea.vmem %s2919_s0, %s1903_s12  ;;  %v2291_v11 = vld [vmem:[%s2918_s2 + $0x20] sm:$0xff]   ;;  %v2299_v12 = vld [vmem:[%s2920_s3 + $0x10] sm:$0xff]   ;;  %v2292_v13 = vld [vmem:[%s2918_s2 + $0x38] sm:$0xff]   ;;  %930 = vst.msk [vmem:[%s2806_s27] sm:$0x1] %vm929_vm6, %v2436_v1  ;;  %vm1497_vm7 = vcmask 195712  }
  0x1f   : > { %v384_v3 = vld [vmem:[%s378_s22] sm:$0xff]  ;;  %2078 = vmatpush3.bf16.msra.mxu1 %v2296_v6  ;;  %v2300_v14 = vld [vmem:[%s2920_s3 + $0x28] sm:$0xff]   ;;  %v2293_v15 = vld [vmem:[%s2918_s2 + $0x30] sm:$0xff]   ;;  %s2439_s22 = smov 16   ;;  %s2440_s12 = smov 24   ;;  %vm1686_vm8 = vcmask 261312  }
  0x20   : > { %v2575_v5 = vpack.c.bf16 %v384_v3, %v384_v3  ;;  %2079 = vmatprep.subr.bf16.mxu1 %v2436_v1  ;;  %v2294_v16 = vld [vmem:[%s2921_s1 + $0x8] sm:$0xff]   ;;  %v2295_v17 = vld [vmem:[%s2921_s1] sm:$0xff]   ;;  %v2302_v19 = vld [vmem:[%s2920_s3 + $0x38] sm:$0xff]  }
  0x21   : > { %2072 = vmatpush3.bf16.msra.mxu0 %v2287_v2  ;;  %v2301_v18 = vld [vmem:[%s2920_s3 + $0x20] sm:$0xff]   ;;  %v2303_v20 = vld [vmem:[%s2920_s3 + $0x30] sm:$0xff]  }
  0x22   : > { %2085 = vmatprep.subr.bf16.mxu0 %v2436_v1  ;;  %v1904_v21 = vld [vmem:[%s2906_s5] ss:$0 sm:$0xff]  ;;  %v1917_v28 = vld [vmem:[%s2906_s5 + $0x1] ss:$0 sm:$0xff]  ;;  %v1935_v42 = vld [vmem:[%s2906_s5 + $0x2] ss:$0 sm:$0xff] }
  0x23   : > { %2080 = vmatpush3.bf16.msra.mxu1 %v2297_v8  ;;  %v1908_v30 = vld [vmem:[%s2907_s6] ss:$0 sm:$0xff]  ;;  %v1926_v46 = vld [vmem:[%s2907_s6 + $0x1] ss:$0 sm:$0xff]  ;;  %v1953_v56 = vld [vmem:[%s2906_s5 + $0x3] ss:$0 sm:$0xff] }
  0x24   : > { %2074 = vmatmul.mubr.msk.bf16.vlgmr.msra.gmra.mxu0 %vm409_vm1, %v2575_v5  ;;  %2093 = vmatprep.subr.bf16.mxu1 %v2436_v1 }
  0x25   : > { %2086 = vmatpush3.bf16.msra.mxu0 %v2288_v4  ;;  %2089 = vmatprep.mubr.msk.bf16.mxu0 %vm2437_vm0, %v2436_v1  ;;  %v1966_v4 = vld [vmem:[%s2905_s4] ss:$0 sm:$0xff] }
  0x26   : > { %2087 = vmatprep.subr.bf16.mxu0 %v2436_v1  ;;  %2082 = vmatmul.mubr.msk.bf16.vlgmr.msra.gmra.mxu1 %vm409_vm1, %v2575_v5 }
  0x27   : > { %2094 = vmatpush3.bf16.msra.mxu1 %v2298_v10  ;;  %2097 = vmatprep.mubr.msk.bf16.mxu1 %vm2437_vm0, %v2436_v1 }
  0x28   : > { %2095 = vmatprep.subr.bf16.mxu1 %v2436_v1 }
  0x29   : > { %2088 = vmatpush3.bf16.msra.mxu0 %v2289_v7 }
  0x2a   : > { %2101 = vmatprep.subr.bf16.mxu0 %v2436_v1 }
  0x2b   : > { %2096 = vmatpush3.bf16.msra.mxu1 %v2299_v12 }
  0x2c   : > { %2090 = vmatmul.mubr.msk.bf16.vlgmr.msra.gmra.mxu0 %vm409_vm1, %v2575_v5  ;;  %2109 = vmatprep.subr.bf16.mxu1 %v2436_v1 }
  0x2d   : > { %2102 = vmatpush3.bf16.msra.mxu0 %v2290_v9  ;;  %2105 = vmatprep.mubr.msk.bf16.mxu0 %vm2437_vm0, %v2436_v1 }
  0x2e   : > { %2103 = vmatprep.subr.bf16.mxu0 %v2436_v1  ;;  %2098 = vmatmul.mubr.msk.bf16.vlgmr.msra.gmra.mxu1 %vm409_vm1, %v2575_v5 }
  0x2f   : > { %2110 = vmatpush3.bf16.msra.mxu1 %v2300_v14  ;;  %2113 = vmatprep.mubr.msk.bf16.mxu1 %vm2437_vm0, %v2436_v1  ;;  %v2305_v14 = vld [vmem:[%s2921_s1 + $0x10] sm:$0xff]  }
  0x30   : > { %2111 = vmatprep.subr.bf16.mxu1 %v2436_v1 }
  0x31   : > { %2104 = vmatpush3.bf16.msra.mxu0 %v2291_v11  ;;  %v2304_v11 = vld [vmem:[%s2921_s1 + $0x18] sm:$0xff]  }
  0x32   : > { %2117 = vmatprep.subr.bf16.mxu0 %v2436_v1 }
  0x33   : > { %2112 = vmatpush3.bf16.msra.mxu1 %v2301_v18 }
  0x34   : > { %2106 = vmatmul.mubr.msk.bf16.vlgmr.msra.gmra.mxu0 %vm409_vm1, %v2575_v5  ;;  %2125 = vmatprep.subr.bf16.mxu1 %v2436_v1 }
  0x35   : > { %2118 = vmatpush3.bf16.msra.mxu0 %v2292_v13  ;;  %2121 = vmatprep.mubr.msk.bf16.mxu0 %vm2437_vm0, %v2436_v1 }
  0x36   : > { %2119 = vmatprep.subr.bf16.mxu0 %v2436_v1  ;;  %2114 = vmatmul.mubr.msk.bf16.vlgmr.msra.gmra.mxu1 %vm409_vm1, %v2575_v5 }
  0x37   : > { %2126 = vmatpush3.bf16.msra.mxu1 %v2302_v19  ;;  %2129 = vmatprep.mubr.msk.bf16.mxu1 %vm2437_vm0, %v2436_v1 }
  0x38   : > { %2127 = vmatprep.subr.bf16.mxu1 %v2436_v1 }
  0x39   : > { %2120 = vmatpush3.bf16.msra.mxu0 %v2293_v15 }
  0x3a   : > { %2133 = vmatprep.subr.bf16.mxu0 %v2436_v1 }
  0x3b   : > { %2128 = vmatpush3.bf16.msra.mxu1 %v2303_v20 }
  0x3c   : > { %2122 = vmatmul.mubr.msk.bf16.vlgmr.msra.gmra.mxu0 %vm409_vm1, %v2575_v5  ;;  %2141 = vmatprep.subr.bf16.mxu1 %v2436_v1 }
  0x3d   : > { %2134 = vmatpush3.bf16.msra.mxu0 %v2294_v16  ;;  %2137 = vmatprep.mubr.msk.bf16.mxu0 %vm2437_vm0, %v2436_v1 }
  0x3e   : > { %2135 = vmatprep.subr.bf16.mxu0 %v2436_v1  ;;  %2130 = vmatmul.mubr.msk.bf16.vlgmr.msra.gmra.mxu1 %vm409_vm1, %v2575_v5 }
  0x3f   : > { %2143 = vmatprep.mubr.msk.bf16.mxu1 %vm2437_vm0, %v2436_v1 }
  0x41   : > { %2136 = vmatpush3.bf16.msra.mxu0 %v2295_v17  ;;  %v1944_v17 = vld [vmem:[%s2907_s6 + $0x2] ss:$0 sm:$0xff] }
  0x42   : > { %2147 = vmatprep.subr.bf16.mxu0 %v2436_v1 }
  0x44   : > { %2138 = vmatmul.mubr.msk.bf16.vlgmr.msra.gmra.mxu0 %vm409_vm1, %v2575_v5 }
  0x45   : > { %2149 = vmatprep.mubr.msk.bf16.mxu0 %vm2437_vm0, %v2436_v1 }
  0xe4   : > { %v447_v22 = vpop.f32.mrf.mxu0 }
  0xe5   : > { %v448_v23 = vadd.f32 %v1904_v21, %v447_v22 }
  0xe6   : > { %v2075_v24 = vpop.f32.mrf.mxu0  ;;  %v510_v33 = vpop.f32.mrf.mxu1 }
  0xe7   : > { %v516_v25 = vpack.c.bf16 %v448_v23, %v448_v23  ;;  %v511_v35 = vadd.f32 %v1908_v30, %v510_v33  ;;  %v1962_v24 = vld [vmem:[%s2907_s6 + $0x3] ss:$0 sm:$0xff] }
  0xe8   : > { %v450_v26 = vpop.f32.mrf.mxu0  ;;  %v2083_v38 = vpop.f32.mrf.mxu1 }
  0xe9   : > { %518 = vst.msk [vmem:[#allocation2] sm:$0xf] %vm517_vm2, %v516_v25  ;;  %v519_v40 = vpack.c.bf16 %v511_v35, %v511_v35 }
  0xea   : > { %v2076_v27 = vpop.f32.mrf.mxu0  ;;  %v513_v43 = vpop.f32.mrf.mxu1 }
  0xeb   : > { %520 = vst.msk [vmem:[#allocation3] sm:$0xf] %vm517_vm2, %v519_v40 }
  0xec   : > { %v580_v29 = vpop.f32.mrf.mxu0  ;;  %v2084_v45 = vpop.f32.mrf.mxu1 }
  0xed   : > { %v581_v31 = vadd.f32 %v1917_v28, %v580_v29 }
  0xee   : > { %v2091_v32 = vpop.f32.mrf.mxu0  ;;  %v645_v49 = vpop.f32.mrf.mxu1 }
  0xef   : > { %v651_v34 = vpack.c.bf16 %v581_v31, %v581_v31  ;;  %v646_v51 = vadd.f32 %v1926_v46, %v645_v49  ;;  %v1977_v46 = vld [vmem:[%s2905_s4 + $0x1] ss:$0 sm:$0xff] }
  0xf0   : > { %v583_v36 = vpop.f32.mrf.mxu0  ;;  %v1004_v37 = vld [vmem:[#allocation2] sm:$0xf]  ;;  %v2099_v53 = vpop.f32.mrf.mxu1 }
  0xf1   : > { %653 = vst.msk [vmem:[#allocation2 + $0x4] sm:$0xf] %vm517_vm2, %v651_v34  ;;  %v1010_v39 = vsel %vm1005_vm3, %v1004_v37, 0  ;;  %v654_v54 = vpack.c.bf16 %v646_v51, %v646_v51 }
  0xf2   : > { %v2092_v41 = vpop.f32.mrf.mxu0  ;;  %2142 = vmatpush3.bf16.xpose.msra.mxu1 %v1010_v39  ;;  %v648_v57 = vpop.f32.mrf.mxu1  ;;  %v1072_v58 = vld [vmem:[#allocation3] sm:$0xf] }
  0xf3   : > { %2153 = vmatprep.subr.bf16.mxu1 %v2436_v1  ;;  %656 = vst.msk [vmem:[#allocation3 + $0x4] sm:$0xf] %vm517_vm2, %v654_v54  ;;  %v1078_v59 = vsel %vm1076_vm4, %v1072_v58, 0 }
  0xf4   : > { %v716_v44 = vpop.f32.mrf.mxu0  ;;  %v2100_v61 = vpop.f32.mrf.mxu1  ;;  %2148 = vmatpush3.bf16.msra.mxu0 %v1078_v59 }
  0xf5   : > { %v717_v47 = vadd.f32 %v1935_v42, %v716_v44  ;;  %2161 = vmatprep.subr.bf16.mxu0 %v2436_v1 }
  0xf6   : > { %v2107_v48 = vpop.f32.mrf.mxu0  ;;  %v781_v18 = vpop.f32.mrf.mxu1 }
  0xf7   : > { %v787_v50 = vpack.c.bf16 %v717_v47, %v717_v47  ;;  %v782_v19 = vadd.f32 %v1944_v17, %v781_v18 }
  0xf8   : > { %v719_v52 = vpop.f32.mrf.mxu0  ;;  %v2115_v20 = vpop.f32.mrf.mxu1 }
  0xf9   : > { %789 = vst.msk [vmem:[#allocation2 + $0x8] sm:$0xf] %vm517_vm2, %v787_v50  ;;  %v790_v21 = vpack.c.bf16 %v782_v19, %v782_v19  ;;  %v1189_v50 = vld [vmem:[#allocation2 + $0x4] sm:$0xf]  ;;  %v1988_v19 = vld [vmem:[%s2905_s4 + $0x2] ss:$0 sm:$0xff] }
  0xfa   : > { %v2108_v55 = vpop.f32.mrf.mxu0  ;;  %v1257_v15 = vld [vmem:[#allocation3 + $0x4] sm:$0xf]  ;;  %v784_v22 = vpop.f32.mrf.mxu1  ;;  %v1194_v53 = vsel %vm1005_vm3, %v1189_v50, 0 }
  0xfb   : > { %v1262_v16 = vsel %vm1076_vm4, %v1257_v15, 0  ;;  %792 = vst.msk [vmem:[#allocation3 + $0x8] sm:$0xf] %vm517_vm2, %v790_v21  ;;  %v2306_v55 = vld [vmem:[%s2921_s1 + $0x28] sm:$0xff]  }
  0xfc   : > { %v852_v60 = vpop.f32.mrf.mxu0  ;;  %v2116_v23 = vpop.f32.mrf.mxu1 }
  0xfd   : > { %v853_v62 = vadd.f32 %v1953_v56, %v852_v60  ;;  %v2307_v56 = vld [vmem:[%s2921_s1 + $0x20] sm:$0xff]  }
  0xfe   : > { %v2123_v63 = vpop.f32.mrf.mxu0  ;;  %v917_v25 = vpop.f32.mrf.mxu1 }
  0xff   : > { %v923_v0 = vpack.c.bf16 %v853_v62, %v853_v62  ;;  %v918_v26 = vadd.f32 %v1962_v24, %v917_v25 }
 0x100   : > { %v855_v2 = vpop.f32.mrf.mxu0  ;;  %v2131_v27 = vpop.f32.mrf.mxu1  ;;  %v1378_v24 = vld [vmem:[#allocation2 + $0x8] sm:$0xf] }
 0x101   : > { %925 = vst.msk [vmem:[#allocation2 + $0xc] sm:$0xf] %vm517_vm2, %v923_v0  ;;  %v926_v28 = vpack.c.bf16 %v918_v26, %v918_v26 }
 0x102   : > { %v2124_v3 = vpop.f32.mrf.mxu0  ;;  %v920_v29 = vpop.f32.mrf.mxu1  ;;  %v1446_v57 = vld [vmem:[#allocation3 + $0x8] sm:$0xf] }
 0x103   : > { %928 = vst.msk [vmem:[#allocation3 + $0xc] sm:$0xf] %vm517_vm2, %v926_v28  ;;  %v1451_v58 = vsel %vm1076_vm4, %v1446_v57, 0  ;;  %v1383_v29 = vsel %vm1005_vm3, %v1378_v24, 0 }
 0x104   : > { %v996_v6 = vpop.f32.mrf.mxu0  ;;  %v2132_v30 = vpop.f32.mrf.mxu1 }
 0x105   : > { %v997_v7 = vadd.f32 %v1966_v4, %v996_v6 }
 0x106   : > { %v2139_v8 = vpop.f32.mrf.mxu0 }
 0x107   : > { %v1002_v9 = vmul.f32 0.35355338, %v997_v7 }
 0x108   : > { %v999_v10 = vpop.f32.mrf.mxu0 }
 0x109   : > { %v1003_v12 = vpack.c.bf16 %v1002_v9, %v1002_v9 }
 0x10a   : > { %v2140_v13 = vpop.f32.mrf.mxu0 }
 0x10b   : > { %2144 = vmatmul.mubr.msk.bf16.vlgmr.msra.gmra.mxu1 %vm1005_vm3, %v1003_v12 }
 0x10c   : > { %2154 = vmatpush3.bf16.msra.mxu1 %v2304_v11  ;;  %2157 = vmatprep.mubr.msk.bf16.mxu1 %vm2437_vm0, %v2436_v1 }
 0x10d   : > { %2155 = vmatprep.subr.bf16.mxu1 %v2436_v1 }
 0x110   : > { %2156 = vmatpush3.bf16.msra.mxu1 %v2305_v14 }
 0x111   : > { %2167 = vmatprep.subr.bf16.mxu1 %v2436_v1 }
 0x113   : > { %2158 = vmatmul.mubr.msk.bf16.vlgmr.msra.gmra.mxu1 %vm409_vm1, %v2575_v5 }
 0x114   : > { %2168 = vmatpush3.bf16.msra.mxu1 %v1262_v16  ;;  %2169 = vmatprep.mubr.msk.bf16.mxu1 %vm2437_vm0, %v2436_v1 }
 0x115   : > { %2181 = vmatprep.subr.bf16.mxu1 %v2436_v1 }
 0x1cb   : > { %v1046_v31 = vpop.f32.mrf.mxu1 }
 0x1cc   : > { %v1052_v32 = vsel %vm1005_vm3, %v1046_v31, -inf }
 0x1cd   : > { %1053 = vmax.xlane.f32.xlu0 %v1052_v32  ;;  %v2145_v33 = vpop.f32.mrf.mxu1 }
 0x1cf   : > { %v1049_v34 = vpop.f32.mrf.mxu1 }
 0x1d1   : > { %v2146_v35 = vpop.f32.mrf.mxu1 }
 0x1d3   : > { %v1180_v41 = vpop.f32.mrf.mxu1 }
 0x1d4   : > { %v1181_v48 = vadd.f32 %v1977_v46, %v1180_v41 }
 0x1d5   : > { %v2159_v42 = vpop.f32.mrf.mxu1 }
 0x1d6   : > { %v1186_v52 = vmul.f32 0.35355338, %v1181_v48  ;;  %v1635_v42 = vld [vmem:[#allocation3 + $0xc] sm:$0xf] }
 0x1d7   : > { %v1183_v43 = vpop.f32.mrf.mxu1 }
 0x1d8   : > { %v1187_v54 = vpack.c.bf16 %v1186_v52, %v1186_v52  ;;  %v1640_v43 = vsel %vm1076_vm4, %v1635_v42, 0 }
 0x1d9   : > { %v2160_v44 = vpop.f32.mrf.mxu1 }
 0x256   : > { %v1054_v36 = vpop.xlane.xlu0 %1053 }
 0x257   : > { %v1055_v37 = vsub.f32 %v1046_v31, %v1054_v36  ;;  %v2308_v36 = vld [vmem:[%s2921_s1 + $0x38] sm:$0xff]  }
 0x259   : > { %v1056_v38 = vmul.f32 1.442695, %v1055_v37 }
 0x25b   : > { %2312 = vpow2.f32 %v1056_v38 }
 0x268   : > { %v2313_v39 = vpop.eup %2312 }
 0x269   : > { %v1058_v40 = vsel %vm1005_vm3, %v2313_v39, 0.0 }
 0x26a   : > { %1059 = vadd.xlane.f32.xlu0 %v1058_v40  ;;  %v2309_v40 = vld [vmem:[%s2921_s1 + $0x30] sm:$0xff]  }
 0x2f3   : > { %v1060_v45 = vpop.xlane.xlu0 %1059 }
 0x2f4   : > { %2314 = vrcp.f32 %v1060_v45 }
 0x301   : > { %v2315_v47 = vpop.eup %2314 }
 0x302   : > { %v1062_v49 = vmul.f32 %v2315_v47, %v2313_v39 }
 0x304   : > { %v1071_v51 = vpack.c.bf16 %v1062_v49, %v1062_v49  ;;  %v1063_v16 = vsel %vm1005_vm3, %v1062_v49, 0.0 }
 0x305   : > { %v1064_v17 = vrot.slane %v1063_v16, 4 }
 0x306   : > { %2150 = vmatmul.mubr.msk.bf16.vlgmr.msra.gmra.mxu0 %vm1005_vm3, %v1071_v51 }
 0x307   : > { %2162 = vmatpush3.bf16.xpose.msra.mxu0 %v1194_v53  ;;  %2163 = vmatprep.mubr.msk.bf16.mxu0 %vm2437_vm0, %v2436_v1  ;;  %v1065_v18 = vadd.f32 %v1064_v17, %v1063_v16 }
 0x308   : > { %2173 = vmatprep.subr.bf16.mxu0 %v2436_v1 }
 0x309   : > { %v1066_v23 = vrot.slane %v1065_v18, 2 }
 0x30b   : > { %v1067_v30 = vadd.f32 %v1066_v23, %v1065_v18 }
 0x30d   : > { %v1068_v34 = vrot.slane %v1067_v30, 1 }
 0x30e   : > { %2164 = vmatmul.mubr.msk.bf16.vlgmr.msra.gmra.mxu0 %vm1005_vm3, %v1187_v54 }
 0x30f   : > { %2174 = vmatpush3.bf16.msra.mxu0 %v2306_v55  ;;  %2177 = vmatprep.mubr.msk.bf16.mxu0 %vm2437_vm0, %v2436_v1  ;;  %v1069_v38 = vadd.f32 %v1068_v34, %v1067_v30 }
 0x310   : > { %2175 = vmatprep.subr.bf16.mxu0 %v2436_v1 }
 0x313   : > { %2176 = vmatpush3.bf16.msra.mxu0 %v2307_v56 }
 0x314   : > { %2187 = vmatprep.subr.bf16.mxu0 %v2436_v1 }
 0x316   : > { %2178 = vmatmul.mubr.msk.bf16.vlgmr.msra.gmra.mxu0 %vm409_vm1, %v2575_v5 }
 0x317   : > { %2188 = vmatpush3.bf16.msra.mxu0 %v1451_v58  ;;  %2189 = vmatprep.mubr.msk.bf16.mxu0 %vm2437_vm0, %v2436_v1 }
 0x318   : > { %2201 = vmatprep.subr.bf16.mxu0 %v2436_v1 }
 0x3c6   : > { %v1114_v59 = vpop.f32.mrf.mxu0 }
 0x3c7   : > { %1120 = vst.msk [vmem:[#allocation4] sm:$0xff] %vm1005_vm3, %v1114_v59 }
 0x3c8   : > { %v2151_v60 = vpop.f32.mrf.mxu0 }
 0x3ca   : > { %v1117_v61 = vpop.f32.mrf.mxu0 }
 0x3cc   : > { %v2152_v62 = vpop.f32.mrf.mxu0 }
 0x3cd   : > { %v1999_v62 = vld [vmem:[%s2905_s4 + $0x3] ss:$0 sm:$0xff] }
 0x3ce   : > { %v1230_v63 = vpop.f32.mrf.mxu0 }
 0x3cf   : > { %v1236_v0 = vsel %vm1005_vm3, %v1230_v63, -inf }
 0x3d0   : > { %1237 = vmax.xlane.f32.xlu1 %v1236_v0  ;;  %v2165_v2 = vpop.f32.mrf.mxu0 }
 0x3d2   : > { %v1233_v3 = vpop.f32.mrf.mxu0 }
 0x3d3   : > { %v1567_v3 = vld [vmem:[#allocation2 + $0xc] sm:$0xf] }
 0x3d4   : > { %v2166_v4 = vpop.f32.mrf.mxu0 }
 0x3d6   : > { %v1369_v11 = vpop.f32.mrf.mxu0 }
 0x3d7   : > { %v1370_v21 = vadd.f32 %v1988_v19, %v1369_v11 }
 0x3d8   : > { %v2179_v12 = vpop.f32.mrf.mxu0 }
 0x3d9   : > { %v1375_v28 = vmul.f32 0.35355338, %v1370_v21 }
 0x3da   : > { %v1372_v13 = vpop.f32.mrf.mxu0 }
 0x3db   : > { %v1376_v33 = vpack.c.bf16 %v1375_v28, %v1375_v28 }
 0x3dc   : > { %v2180_v14 = vpop.f32.mrf.mxu0 }
 0x459   : > { %v1238_v6 = vpop.xlane.xlu1 %1237 }
 0x45a   : > { %v1239_v7 = vsub.f32 %v1230_v63, %v1238_v6 }
 0x45c   : > { %v1240_v8 = vmul.f32 1.442695, %v1239_v7 }
 0x45e   : > { %2316 = vpow2.f32 %v1240_v8 }
 0x46b   : > { %v2317_v9 = vpop.eup %2316 }
 0x46c   : > { %v1242_v10 = vsel %vm1005_vm3, %v2317_v9, 0.0 }
 0x46d   : > { %1243 = vadd.xlane.f32.xlu1 %v1242_v10 }
 0x4f6   : > { %v1244_v15 = vpop.xlane.xlu1 %1243 }
 0x4f7   : > { %2318 = vrcp.f32 %v1244_v15 }
 0x504   : > { %v2319_v20 = vpop.eup %2318 }
 0x505   : > { %v1246_v22 = vmul.f32 %v2319_v20, %v2317_v9  ;;  %v1572_v9 = vsel %vm1005_vm3, %v1567_v3, 0 }
 0x507   : > { %v1247_v25 = vsel %vm1005_vm3, %v1246_v22, 0.0  ;;  %v1255_v26 = vpack.c.bf16 %v1246_v22, %v1246_v22 }
 0x508   : > { %v1248_v27 = vrot.slane %v1247_v25, 4 }
 0x509   : > { %2170 = vmatmul.mubr.msk.bf16.vlgmr.msra.gmra.mxu1 %vm1005_vm3, %v1255_v26 }
 0x50a   : > { %v1249_v31 = vadd.f32 %v1248_v27, %v1247_v25  ;;  %2182 = vmatpush3.bf16.xpose.msra.mxu1 %v1383_v29  ;;  %2183 = vmatprep.mubr.msk.bf16.mxu1 %vm2437_vm0, %v2436_v1 }
 0x50b   : > { %2193 = vmatprep.subr.bf16.mxu1 %v2436_v1 }
 0x50c   : > { %v1250_v32 = vrot.slane %v1249_v31, 2 }
 0x50e   : > { %v1251_v35 = vadd.f32 %v1250_v32, %v1249_v31 }
 0x510   : > { %v1252_v37 = vrot.slane %v1251_v35, 1 }
 0x511   : > { %2184 = vmatmul.mubr.msk.bf16.vlgmr.msra.gmra.mxu1 %vm1005_vm3, %v1376_v33 }
 0x512   : > { %v1253_v39 = vadd.f32 %v1252_v37, %v1251_v35  ;;  %2194 = vmatpush3.bf16.msra.mxu1 %v2308_v36  ;;  %2197 = vmatprep.mubr.msk.bf16.mxu1 %vm2437_vm0, %v2436_v1 }
 0x513   : > { %2195 = vmatprep.subr.bf16.mxu1 %v2436_v1 }
 0x514   : > { %v1254_v41 = vadd.f32 %v1253_v39, %v1069_v38 }
 0x516   : > { %2196 = vmatpush3.bf16.msra.mxu1 %v2309_v40 }
 0x517   : > { %2207 = vmatprep.subr.bf16.mxu1 %v2436_v1 }
 0x519   : > { %2198 = vmatmul.mubr.msk.bf16.vlgmr.msra.gmra.mxu1 %vm409_vm1, %v2575_v5 }
 0x51a   : > { %2208 = vmatpush3.bf16.msra.mxu1 %v1640_v43  ;;  %2209 = vmatprep.mubr.msk.bf16.mxu1 %vm2437_vm0, %v2436_v1 }
 0x5c9   : > { %v1298_v44 = vpop.f32.mrf.mxu1 }
 0x5cb   : > { %v2171_v45 = vpop.f32.mrf.mxu1 }
 0x5cd   : > { %v1301_v46 = vpop.f32.mrf.mxu1 }
 0x5cf   : > { %v2172_v47 = vpop.f32.mrf.mxu1 }
 0x5d1   : > { %v1419_v48 = vpop.f32.mrf.mxu1 }
 0x5d2   : > { %v1425_v49 = vsel %vm1005_vm3, %v1419_v48, -inf }
 0x5d3   : > { %1426 = vmax.xlane.f32.xlu0 %v1425_v49  ;;  %v2185_v50 = vpop.f32.mrf.mxu1  ;;  %v2310_v49 = vld [vmem:[%s2908_s7 + $0x8] sm:$0xff]  }
 0x5d4   : > { %v2311_v50 = vld [vmem:[%s2908_s7] sm:$0xff]  }
 0x5d5   : > { %v1422_v51 = vpop.f32.mrf.mxu1 }
 0x5d7   : > { %v2186_v52 = vpop.f32.mrf.mxu1 }
 0x5d9   : > { %v1558_v57 = vpop.f32.mrf.mxu1 }
 0x5da   : > { %v1559_v0 = vadd.f32 %v1999_v62, %v1558_v57 }
 0x5db   : > { %v2199_v58 = vpop.f32.mrf.mxu1 }
 0x5dc   : > { %v1564_v8 = vmul.f32 0.35355338, %v1559_v0 }
 0x5dd   : > { %v1561_v59 = vpop.f32.mrf.mxu1 }
 0x5de   : > { %v1565_v12 = vpack.c.bf16 %v1564_v8, %v1564_v8 }
 0x5df   : > { %v2200_v60 = vpop.f32.mrf.mxu1 }
 0x65c   : > { %v1427_v53 = vpop.xlane.xlu0 %1426 }
 0x65d   : > { %v1428_v54 = vsub.f32 %v1419_v48, %v1427_v53 }
 0x65f   : > { %v1429_v5 = vmul.f32 1.442695, %v1428_v54 }
 0x661   : > { %2320 = vpow2.f32 %v1429_v5 }
 0x66e   : > { %v2321_v55 = vpop.eup %2320 }
 0x66f   : > { %v1431_v56 = vsel %vm1005_vm3, %v2321_v55, 0.0 }
 0x670   : > { %1432 = vadd.xlane.f32.xlu1 %v1431_v56 }
 0x6f9   : > { %v1433_v61 = vpop.xlane.xlu1 %1432 }
 0x6fa   : > { %2322 = vrcp.f32 %v1433_v61 }
 0x707   : > { %v2323_v63 = vpop.eup %2322 }
 0x708   : > { %v1435_v2 = vmul.f32 %v2323_v63, %v2321_v55 }
 0x70a   : > { %v1436_v4 = vsel %vm1005_vm3, %v1435_v2, 0.0  ;;  %v1444_v6 = vpack.c.bf16 %v1435_v2, %v1435_v2 }
 0x70b   : > { %v1437_v7 = vrot.slane %v1436_v4, 4 }
 0x70c   : > { %2190 = vmatmul.mubr.msk.bf16.vlgmr.msra.gmra.mxu0 %vm1005_vm3, %v1444_v6 }
 0x70d   : > { %v1438_v10 = vadd.f32 %v1437_v7, %v1436_v4  ;;  %2202 = vmatpush3.bf16.xpose.msra.mxu0 %v1572_v9  ;;  %2203 = vmatprep.mubr.msk.bf16.mxu0 %vm2437_vm0, %v2436_v1 }
 0x70e   : > { %2213 = vmatprep.subr.bf16.mxu0 %v2436_v1 }
 0x70f   : > { %v1439_v11 = vrot.slane %v1438_v10, 2 }
 0x711   : > { %v1440_v13 = vadd.f32 %v1439_v11, %v1438_v10 }
 0x713   : > { %v1441_v14 = vrot.slane %v1440_v13, 1 }
 0x714   : > { %2204 = vmatmul.mubr.msk.bf16.vlgmr.msra.gmra.mxu0 %vm1005_vm3, %v1565_v12 }
 0x715   : > { %2217 = vmatprep.mubr.msk.bf16.mxu0 %vm2437_vm0, %v2436_v1  ;;  %v1442_v15 = vadd.f32 %v1441_v14, %v1440_v13  ;;  %2214 = vmatpush3.bf16.msra.mxu0 %v2310_v49 }
 0x716   : > { %2215 = vmatprep.subr.bf16.mxu0 %v2436_v1 }
 0x717   : > { %v1443_v16 = vadd.f32 %v1442_v15, %v1254_v41 }
 0x719   : > { %2216 = vmatpush3.bf16.msra.mxu0 %v2311_v50 }
 0x7cc   : > { %v1487_v17 = vpop.f32.mrf.mxu0 }
 0x7ce   : > { %v2191_v18 = vpop.f32.mrf.mxu0 }
 0x7d0   : > { %v1490_v19 = vpop.f32.mrf.mxu0 }
 0x7d2   : > { %v2192_v20 = vpop.f32.mrf.mxu0 }
 0x7d4   : > { %v1608_v21 = vpop.f32.mrf.mxu0 }
 0x7d5   : > { %v1614_v22 = vsel %vm1005_vm3, %v1608_v21, -inf }
 0x7d6   : > { %1615 = vmax.xlane.f32.xlu0 %v1614_v22  ;;  %v2205_v23 = vpop.f32.mrf.mxu0 }
 0x7d8   : > { %v1611_v24 = vpop.f32.mrf.mxu0 }
 0x7da   : > { %v2206_v25 = vpop.f32.mrf.mxu0 }
 0x7ec   : > { %1305 = vrot.lane.b32.xlu0 %v1298_v44, %s2438_s20  ;;  %v1757_v44 = vld [vmem:[%s2806_s27] sm:$0x1]  ;;  %s1799_s20 = sshll.u32 %s2806_s27, 4  ;;  %s1800_s20 = int_to_ptr.vmem [resolvable:$true] %s1799_s20 }
 0x7ed   : > { %s2328_s11 = scalar_lea.vmem %s1800_s20, 16 }
 0x7ee   : > { %p2329_p12 = scmp.ne.s32.totalorder %s1800_s20, %s2328_s11 }
 0x7f0   : > { %p2330_p13 = pnand %p2329_p12, %p2538_p4 }
 0x7f2   : > { %p2331_p0 = pneg %p2330_p13 }
 0x85f   : > { %v1616_v26 = vpop.xlane.xlu0 %1615 }
 0x860   : > { %v1617_v27 = vsub.f32 %v1608_v21, %v1616_v26 }
 0x862   : > { %v1618_v28 = vmul.f32 1.442695, %v1617_v27 }
 0x863   : > { %v1306_v29 = vpop.permute.xlu0 %1305 }
 0x864   : > { %2324 = vpow2.f32 %v1618_v28  ;;  %1309 = vst.msk [vmem:[#allocation4] sm:$0xff] %vm1308_vm5, %v1306_v29 }
 0x871   : > { %v2325_v30 = vpop.eup %2324 }
 0x872   : > { %v1620_v31 = vsel %vm1005_vm3, %v2325_v30, 0.0 }
 0x873   : > { %1621 = vadd.xlane.f32.xlu1 %v1620_v31 }
 0x884   : > { %1494 = vrot.lane.b32.xlu1 %v1487_v17, %s2439_s22 }
 0x8fc   : > { %v1622_v32 = vpop.xlane.xlu1 %1621 }
 0x8fd   : > { %2326 = vrcp.f32 %v1622_v32 }
 0x900   : > { %v1495_v33 = vpop.permute.xlu1 %1494 }
 0x901   : > { %1498 = vst.msk [vmem:[#allocation4] sm:$0xff] %vm1497_vm7, %v1495_v33 }
 0x90a   : > { %v2327_v34 = vpop.eup %2326 }
 0x90b   : > { %v1624_v35 = vmul.f32 %v2327_v34, %v2325_v30 }
 0x90d   : > { %v1625_v36 = vsel %vm1005_vm3, %v1624_v35, 0.0  ;;  %v1633_v37 = vpack.c.bf16 %v1624_v35, %v1624_v35 }
 0x90e   : > { %v1626_v38 = vrot.slane %v1625_v36, 4 }
 0x90f   : > { %2210 = vmatmul.mubr.msk.bf16.vlgmr.msra.gmra.mxu1 %vm1005_vm3, %v1633_v37 }
 0x910   : > { %v1627_v39 = vadd.f32 %v1626_v38, %v1625_v36 }
 0x912   : > { %v1628_v40 = vrot.slane %v1627_v39, 2 }
 0x914   : > { %v1629_v41 = vadd.f32 %v1628_v40, %v1627_v39 }
 0x916   : > { %v1630_v42 = vrot.slane %v1629_v41, 1 }
 0x918   : > { %v1631_v43 = vadd.f32 %v1630_v42, %v1629_v41 }
 0x91a   : > { %v1632_v45 = vadd.f32 %v1631_v43, %v1443_v16 }
 0x91c   : > { %v1758_v46 = vadd.f32 %v1757_v44, %v1632_v45 }
 0x91e   : > { %1760 = vst.msk [vmem:[%s2806_s27] sm:$0x1] %vm929_vm6, %v1758_v46 }
 0x925   : > { %v1764_v47 = vld [vmem:[%s2806_s27] sm:$0x1] }
 0x926   : > { %v1765_v48 = vmul.f32 0.03125, %v1764_v47 }
 0x928   : > { %1766 = vst.msk [vmem:[%s2806_s27] sm:$0x1] %vm929_vm6, %v1765_v48 }
 0x9cf   : > { %v1676_v51 = vpop.f32.mrf.mxu1 }
 0x9d0   : > { %1683 = vrot.lane.b32.xlu1 %v1676_v51, %s2440_s12  ;;  %s2441_s12 = smov [#allocation7]  }
 0x9d1   : > { %v2211_v52 = vpop.f32.mrf.mxu1  ;;  %s2332_s0 = sshll.u32 %s2441_s12, 4  ;;  %s2333_s0 = int_to_ptr.vmem [resolvable:$false] %s2332_s0 }
 0x9d2   : > { %s2334_s1 = scalar_lea.vmem %s2333_s0, 32  ;;  %p2335_p1 = scmp.lt.s32.totalorder %s1800_s20, %s2333_s0 }
 0x9d3   : > { %v1679_v53 = vpop.f32.mrf.mxu1  ;;  %p2336_p2 = scmp.lt.s32.totalorder %s2334_s1, %s2328_s11 }
 0x9d5   : > { %v2212_v54 = vpop.f32.mrf.mxu1  ;;  %p2337_p3 = por %p2336_p2, %p2335_p1 }
 0x9d7   : > { %p2338_p5 = pnand %p2337_p3, %p2331_p0 }
 0xa42   : > { %v1684_v5 = vpop.permute.xlu1 %1683 }
 0xa43   : > { %1687 = vst.msk [vmem:[#allocation4] sm:$0xff] %vm1686_vm8, %v1684_v5 }
 0xa4a   : > { %v1688_v55 = vld [vmem:[#allocation4] sm:$0xff] }
 0xa4b   : > { %v1689_v56 = vpack.c.bf16 %v1688_v55, %v1688_v55 }
 0xa4d   : > { %2218 = vmatmul.mubr.msk.bf16.vlgmr.msra.gmra.mxu0 %vm409_vm1, %v1689_v56 }
 0xa4e   : > { %2341 = shalt.err (!%p2338_p5)
}
 0xa4f   : > { %s2342_s27 = scalar_lea.hbm %s1797_s29, 16  ;;  %s2346_s28 = scalar_lea.hbm %s2911_s10, 32 }
 0xa50   : > { %p2343_p6 = scmp.ne.s32.totalorder %s1797_s29, %s2342_s27  ;;  %p2347_p10 = scmp.lt.s32.totalorder %s1797_s29, %s2911_s10 }
 0xa51   : > { %p2348_p11 = scmp.lt.s32.totalorder %s2346_s28, %s2342_s27 }
 0xa52   : > { %p2344_p7 = pnand %p2343_p6, %p2538_p4 }
 0xa53   : > { %p2349_p12 = por %p2348_p11, %p2347_p10 }
 0xa54   : > { %p2345_p9 = pneg %p2344_p7 }
 0xa56   : > { %p2350_p13 = pnand %p2349_p12, %p2345_p9 }
 0xa58   : > { %2353 = shalt.err (!%p2350_p13)
}
 0xa59   : > { %2222 = dma.vmem_to_hbm [thread:$0]  (%p2538_p4), %s1800_s20, 16, %s1797_s29, %s1773_s30   ;;  %v2005_v1 = vld [vmem:[%s2909_s8] ss:$0 sm:$0xff] }
 0xa5a   : > { %s1902_s0 = sshll.u32 %s2803_s24, 3  ;;  %s2010_s12 = sshll.u32 %s2426_s16, 7 }
 0xa5b   : > { %s368_s19 = scalar_lea.vmem [#allocation5], %s1902_s0  ;;  %s2853_s22 = scalar_lea.hbm %s2910_s9, %s2010_s12 }
 0xa5c   : > { %s1786_s2 = sshll.u32 %s368_s19, 4  ;;  %s1768_s20 = scalar_lea.sflag [#allocation6], %s2803_s24  ;;  %s2855_s2 = int_to_ptr.vmem [resolvable:$true] %s1786_s2 }
 0xa5d   : > { %s2354_s16 = scalar_lea.vmem %s2855_s2, 128  ;;  %s2442_s29 = smov [#allocation5]  }
 0xa5e   : > { %p2355_p0 = scmp.ne.s32.totalorder %s2855_s2, %s2354_s16  ;;  %s2358_s30 = sshll.u32 %s2442_s29, 4  ;;  %s2359_s30 = int_to_ptr.vmem [resolvable:$false] %s2358_s30 }
 0xa5f   : > { %s2360_s28 = scalar_lea.vmem %s2359_s30, 256  ;;  %p2361_p3 = scmp.lt.s32.totalorder %s2855_s2, %s2359_s30 }
 0xa60   : > { %p2356_p1 = pnand %p2355_p0, %p2538_p4  ;;  %p2362_p5 = scmp.lt.s32.totalorder %s2360_s28, %s2354_s16 }
 0xa62   : > { %p2357_p2 = pneg %p2356_p1  ;;  %p2363_p6 = por %p2362_p5, %p2361_p3 }
 0xa64   : > { %p2364_p7 = pnand %p2363_p6, %p2357_p2 }
 0xb0d   : > { %v1750_v57 = vpop.f32.mrf.mxu0 }
 0xb0e   : > { %v1751_v58 = vadd.f32 %v2005_v1, %v1750_v57 }
 0xb0f   : > { %v2219_v59 = vpop.f32.mrf.mxu0 }
 0xb10   : > { %1756 = vst.msk [vmem:[%s368_s19] sm:$0xff] %vm409_vm1, %v1751_v58 }
 0xb11   : > { %v1753_v60 = vpop.f32.mrf.mxu0 }
 0xb12   : > { %2367 = shalt.err (!%p2364_p7)
}
 0xb13   : > { %s2368_s0 = scalar_lea.hbm %s2853_s22, 128  ;;  %s2372_s11 = scalar_lea.hbm %s2910_s9, 256 }
 0xb14   : > { %p2369_p9 = scmp.ne.s32.totalorder %s2853_s22, %s2368_s0  ;;  %p2373_p12 = scmp.lt.s32.totalorder %s2853_s22, %s2910_s9 }
 0xb15   : > { %p2374_p13 = scmp.lt.s32.totalorder %s2372_s11, %s2368_s0 }
 0xb16   : > { %p2370_p10 = pnand %p2369_p9, %p2538_p4 }
 0xb17   : > { %p2375_p0 = por %p2374_p13, %p2373_p12 }
 0xb18   : > { %p2371_p11 = pneg %p2370_p10 }
 0xb1a   : > { %p2376_p1 = pnand %p2375_p0, %p2371_p11 }
 0xb1c   : > { %2379 = shalt.err (!%p2376_p1)
}
 0xb1d   : > { %2221 = dma.vmem_to_hbm [thread:$0]  (%p2538_p4), %s2855_s2, 128, %s2853_s22, %s1768_s20   ;;  %v2220_v61 = vpop.f32.mrf.mxu0 }
 0xb1e PF: > { %p2232_p2 = scmp.ge.s32.totalorder %s2434_s18, 2  ;;  %s1811_s3 = sand.u32 1, %s2414_s13  }
 0xb1f   : > { %s1812_s27 = scalar_lea.sflag [#allocation6], %s1811_s3 }
 0xb20   : > { %p2226_p3 = pnand %p2232_p2, %p2545_p8 }
 0xb22   : > { %p2227_p5 = pneg %p2226_p3 }
 0xb24   : > { %2405 = dma.done.wait (%p2227_p5), %s1812_s27, 128  }
 0xb25   : > { %2407 = vsyncadd (%p2227_p5), %s1812_s27, 4294967168  ;;  %s1821_s16 = scalar_lea.sflag [#allocation8], %s1811_s3 }
 0xb26   : > { %2409 = dma.done.wait (%p2227_p5), %s1821_s16, 16  }
 0xb27   : > { %2411 = vsyncadd (%p2227_p5), %s1821_s16, 4294967280  ;;  %s27_s18 = sadd.s32 1, %s2434_s18   ;;  %s2922_s13 = smov %s2418_s14 }
 0xb28   : > { %p24_p6 = scmp.ge.s32.totalorder %s27_s18, 4   ;;  %s2923_s14 = smov %s2422_s15 }
 0xb29   : > { %s2924_s15 = smov %s2551_s26  ;;  %s2925_s16 = smov %s2430_s17 }
 0xb2a   : > { %s2926_s17 = smov %s2928_s21  ;;  %26 = sbr.rel (!%p24_p6) target bundleno = 11 (0xb), region = 147 }
 0xb2f   :  { %1825 = vsyncpa [#allocation6], 1 }
 0xb30   :  { %1827 = vsyncpa [#allocation6 + $0x1], 1 }
 0xb31   :  { %1828 = vsyncpa [#allocation8], 1 }
 0xb32   :  { %1830 = vsyncpa [#allocation8 + $0x1], 1 }

</bundles_post_ra>
